<compile_context>
chip_gen: v7x
topology: tpu7x:2x2x1
jax: 0.10.0
libtpu: 0.0.40
codegen_flags: <defaults>
</compile_context>

<pallas_src>
import jax
import jax.numpy as jnp
import numpy as np
from jax import lax
from jax.experimental import pallas as pl
from jax.experimental.pallas import tpu as pltpu

TILE_SUB = 8
TILE_LANE = 128
TILE_B = TILE_SUB * TILE_LANE     # 1024 batch elements per (8,128) sub-tile
TB_MAX = 8                        # sub-tiles processed per grid step
TAYLOR_ORDER = 8                  # ||A||_inf <= 0.5 -> truncation error ~5e-9 (< f32 eps)
STATIC_SQUARINGS = 4              # statically-unrolled, per-lane gated squarings
MAX_SQUARINGS = 60                # assumes ||T||_inf < 2^58
SMALL_BATCH_FALLBACK = 256        # below this, dense (8,128) packing is mostly padding


def _mat_entries_mul(X, Y, n):
    """Entry-wise (batched over the (8,128) tile) n x n matrix product."""
    Z = [[None] * n for _ in range(n)]
    for i in range(n):
        for j in range(n):
            acc = X[i][0] * Y[0][j]
            for l in range(1, n):
                acc = acc + X[i][l] * Y[l][j]
            Z[i][j] = acc
    return Z


def _transop_expm_kernel(psi_ref, c_ref, x_ref, o_ref):
    # psi_ref: SMEM f32[M*N*N]          flattened psi, psi[m,p,k] at m*N*N + p*N + k
    # c_ref  : VMEM f32[TB, M, 8, 128]  coefficients, batch packed in the last two dims
    # x_ref  : VMEM f32[TB, N, 8, 128]  latent points
    # o_ref  : VMEM f32[TB, N, 8, 128]  output
    TB, M = c_ref.shape[0], c_ref.shape[1]
    N = x_ref.shape[1]

    @pl.loop(0, TB)
    def _(t):
        c_blk = c_ref[t]                       # (M, 8, 128) - one dense batch sub-tile
        x_blk = x_ref[t]                       # (N, 8, 128)
        c_rows = [c_blk[m] for m in range(M)]

        # ---- T[b] = sum_m c[b, m] * psi[m]   (entry-wise, batch packed in the vreg)
        T = [[None] * N for _ in range(N)]
        for p in range(N):
            for k in range(N):
                acc = psi_ref[p * N + k] * c_rows[0]
                for m in range(1, M):
                    acc = acc + psi_ref[m * N * N + p * N + k] * c_rows[m]
                T[p][k] = acc

        # ---- per-batch inf-norm (max abs row sum)
        norm = None
        for p in range(N):
            r = jnp.abs(T[p][0])
            for k in range(1, N):
                r = r + jnp.abs(T[p][k])
            norm = r if norm is None else jnp.maximum(norm, r)

        # ---- exact power-of-two scaling from exponent bits:
        #      s = clip(floor(log2(norm)) + 2, 0, MAX)  =>  ||A||_inf = ||T||_inf*2^-s <= 0.5
        biased = jnp.bitwise_and(
            jnp.right_shift(pltpu.bitcast(norm, jnp.int32), 23), 0xFF)
        s_i = jnp.clip(biased - 125, 0, MAX_SQUARINGS)                      # i32 (8,128)
        scale = pltpu.bitcast(jnp.left_shift(127 - s_i, 23), jnp.float32)   # exactly 2^-s

        A = [[T[p][k] * scale for k in range(N)] for p in range(N)]

        # ---- Taylor/Horner:  E = I + A (I + A/2 (I + ... A/ORDER))
        E = [[None] * N for _ in range(N)]
        inv_n = 1.0 / float(TAYLOR_ORDER)
        for i in range(N):
            for j in range(N):
                v = A[i][j] * inv_n
                E[i][j] = (v + 1.0) if i == j else v
        for k in range(TAYLOR_ORDER - 1, 0, -1):
            AE = _mat_entries_mul(A, E, N)
            inv_k = 1.0 / float(k)
            for i in range(N):
                for j in range(N):
                    v = AE[i][j] * inv_k
                    E[i][j] = (v + 1.0) if i == j else v

        # ---- repeated squaring, per-lane gated by (it < s_i):
        #      first STATIC_SQUARINGS iterations are unrolled (dense scheduling);
        #      a dynamic fori_loop covers the rare tail up to the in-kernel max.
        def gated_square(it, e_flat):
            Ec = [[e_flat[i * N + j] for j in range(N)] for i in range(N)]
            E2 = _mat_entries_mul(Ec, Ec, N)
            do = it < s_i
            return tuple(jnp.where(do, E2[i][j], Ec[i][j])
                         for i in range(N) for j in range(N))

        e_flat = tuple(E[i][j] for i in range(N) for j in range(N))
        for it in range(STATIC_SQUARINGS):
            e_flat = gated_square(it, e_flat)
        n_sq = jnp.max(s_i)            # cross-lane reduce -> exact per-sub-tile trip count
        e_flat = lax.fori_loop(jnp.int32(STATIC_SQUARINGS), n_sq,
                               gated_square, e_flat)
        E = [[e_flat[i * N + j] for j in range(N)] for i in range(N)]

        # ---- out = expm(T) @ x   (dense (8,128) stores)
        for p in range(N):
            acc = E[p][0] * x_blk[0]
            for k in range(1, N):
                acc = acc + E[p][k] * x_blk[k]
            o_ref[t, p, :, :] = acc


def transop_expm_pallas(psi, c, x):
    """psi: (M, N, N), c: (B, M), x: (B, N, 1) -> out: (B, N, 1). Always runs the kernel."""
    M, N, _ = psi.shape
    B = c.shape[0]

    num_tiles = max(1, -(-B // TILE_B))
    if num_tiles == 1:
        num_steps, tb = 1, 1
    else:
        # >= 2 parallel grid steps so both v7x TensorCores get work; <= TB_MAX sub-tiles/step.
        num_steps = max(2, -(-num_tiles // TB_MAX))
        tb = -(-num_tiles // num_steps)
    tiles_padded = num_steps * tb
    Bp = tiles_padded * TILE_B
    pad = Bp - B

    psi32 = psi.astype(jnp.float32)
    c32 = jnp.pad(c.astype(jnp.float32), ((0, pad), (0, 0)))          # zero coeffs -> expm=I
    x32 = jnp.pad(x[:, :, 0].astype(jnp.float32), ((0, pad), (0, 0)))

    def pack(a):  # (Bp, K) -> (tiles, K, 8, 128): batch packed into dense (8,128) vregs
        K = a.shape[1]
        return a.reshape(tiles_padded, TILE_SUB, TILE_LANE, K).transpose(0, 3, 1, 2)

    c_t = pack(c32)                  # (tiles, M, 8, 128)
    x_t = pack(x32)                  # (tiles, N, 8, 128)
    psi_flat = psi32.reshape(-1)     # (M*N*N,)

    mm = 2 * N ** 3 - N ** 2
    flops_per_elem = (2 * M * N * N + 2 * N * N + 2 * N * N
                      + TAYLOR_ORDER * (mm + N * N + N)
                      + (STATIC_SQUARINGS + 2) * (mm + N * N)
                      + N * (2 * N - 1))

    out_t = pl.pallas_call(
        _transop_expm_kernel,
        out_shape=jax.ShapeDtypeStruct((tiles_padded, N, TILE_SUB, TILE_LANE), jnp.float32),
        grid_spec=pltpu.PrefetchScalarGridSpec(
            num_scalar_prefetch=0,
            grid=(num_steps,),
            in_specs=[
                pl.BlockSpec(memory_space=pltpu.MemorySpace.SMEM),             # psi scalars
                pl.BlockSpec((tb, M, TILE_SUB, TILE_LANE), lambda g: (g, 0, 0, 0)),
                pl.BlockSpec((tb, N, TILE_SUB, TILE_LANE), lambda g: (g, 0, 0, 0)),
            ],
            out_specs=pl.BlockSpec((tb, N, TILE_SUB, TILE_LANE), lambda g: (g, 0, 0, 0)),
        ),
        compiler_params=pltpu.CompilerParams(dimension_semantics=("parallel",)),
        cost_estimate=pl.CostEstimate(
            flops=int(flops_per_elem) * Bp,
            transcendentals=0,
            bytes_accessed=4 * (Bp * (M + 2 * N) + M * N * N)),
    )(psi_flat, c_t, x_t)

    # (tiles, N, 8, 128) -> (B, N, 1)
    out = out_t.transpose(0, 2, 3, 1).reshape(Bp, N)[:B]
    return out[:, :, None].astype(x.dtype)


def transop_expm(psi, c, x):
    """Forward of TransOp_expm. Small batches skip the kernel (padding-dominated)."""
    if c.shape[0] < SMALL_BATCH_FALLBACK:
        T = jnp.einsum('bm,mpk->bpk', c, psi)
        return jax.vmap(jax.scipy.linalg.expm)(T) @ x
    return transop_expm_pallas(psi, c, x)


if __name__ == "__main__":
    key = jax.random.PRNGKey(0)
    k_psi, k_c1, k_x1, k_c2, k_x2 = jax.random.split(key, 5)

    M, N, var = 6, 3, 1e-3

    # Deterministic parameter init mirroring the module's __init__:
    psi = jax.random.normal(k_psi, (M, N, N), jnp.float32) * var
    psi = psi / jnp.linalg.norm(psi.reshape(M, -1), axis=1)[:, None, None]

    def reference(c, x):
        T = jnp.einsum('bm,mpk->bpk', c, psi)
        return jax.vmap(jax.scipy.linalg.expm)(T) @ x

    # 1) Small, module-scale shapes: exercise the Pallas kernel path directly.
    B1 = 8
    c1 = jax.random.normal(k_c1, (B1, M), jnp.float32)
    x1 = jax.random.normal(k_x1, (B1, N, 1), jnp.float32)
    out1 = jax.block_until_ready(jax.jit(transop_expm_pallas)(psi, c1, x1))
    np.testing.assert_allclose(np.asarray(out1), np.asarray(reference(c1, x1)),
                               rtol=1e-4, atol=1e-4)

    # 2) Larger batch: exercises TB>1 sub-tiles per step, a multi-step parallel grid,
    #    tile padding, and the public wrapper's kernel path.
    B2 = 5000
    c2 = jax.random.normal(k_c2, (B2, M), jnp.float32)
    x2 = jax.random.normal(k_x2, (B2, N, 1), jnp.float32)
    out2 = jax.block_until_ready(jax.jit(transop_expm)(psi, c2, x2))
    np.testing.assert_allclose(np.asarray(out2), np.asarray(reference(c2, x2)),
                               rtol=1e-3, atol=1e-3)   # f32 tail: squaring amplifies round-off

    print("KERNEL_OK")
</pallas_src>

<mosaic_0001>
module attributes {stable_mosaic.version = 11 : i64} {
  func.func @_transop_expm_kernel(%arg0: i32, %arg1: memref<54xf32, #tpu.memory_space<smem>>, %arg2: memref<1x6x8x128xf32, #tpu.memory_space<vmem>>, %arg3: memref<1x3x8x128xf32, #tpu.memory_space<vmem>>, %arg4: memref<1x3x8x128xf32, #tpu.memory_space<vmem>>) attributes {dimension_semantics = [#tpu.dimension_semantics<parallel>], iteration_bounds = array<i64: 1>, scalar_prefetch = 0 : i64, scratch_operands = 0 : i64, tpu.core_type = #tpu.core_type<tc>, window_params = [{transform_indices = @transform_0, window_bounds = array<i64: 54>}, {transform_indices = @transform_1, window_bounds = array<i64: 1, 6, 8, 128>}, {transform_indices = @transform_2, window_bounds = array<i64: 1, 3, 8, 128>}, {transform_indices = @transform_3, window_bounds = array<i64: 1, 3, 8, 128>}]} {
    %c0_i32 = arith.constant 0 : i32
    %c1_i32 = arith.constant 1 : i32
    %0 = arith.muli %c0_i32, %c1_i32 : i32
    %c0_i32_0 = arith.constant 0 : i32
    %1 = arith.addi %c0_i32_0, %0 : i32
    %2 = arith.index_cast %1 : i32 to index
    %c0 = arith.constant 0 : index
    %c0_1 = arith.constant 0 : index
    %c0_2 = arith.constant 0 : index
    %3 = vector.load %arg2[%2, %c0, %c0_1, %c0_2] : memref<1x6x8x128xf32, #tpu.memory_space<vmem>>, vector<1x6x8x128xf32>
    %4 = vector.shape_cast %3 : vector<1x6x8x128xf32> to vector<6x8x128xf32>
    %5 = arith.index_cast %1 : i32 to index
    %c0_3 = arith.constant 0 : index
    %c0_4 = arith.constant 0 : index
    %c0_5 = arith.constant 0 : index
    %6 = vector.load %arg3[%5, %c0_3, %c0_4, %c0_5] : memref<1x3x8x128xf32, #tpu.memory_space<vmem>>, vector<1x3x8x128xf32>
    %7 = vector.shape_cast %6 : vector<1x3x8x128xf32> to vector<3x8x128xf32>
    %8 = vector.extract_strided_slice %4 {offsets = [0, 0, 0], sizes = [1, 8, 128], strides = [1, 1, 1]} : vector<6x8x128xf32> to vector<1x8x128xf32>
    %9 = vector.shape_cast %8 : vector<1x8x128xf32> to vector<8x128xf32>
    %10 = vector.extract_strided_slice %4 {offsets = [1, 0, 0], sizes = [1, 8, 128], strides = [1, 1, 1]} : vector<6x8x128xf32> to vector<1x8x128xf32>
    %11 = vector.shape_cast %10 : vector<1x8x128xf32> to vector<8x128xf32>
    %12 = vector.extract_strided_slice %4 {offsets = [2, 0, 0], sizes = [1, 8, 128], strides = [1, 1, 1]} : vector<6x8x128xf32> to vector<1x8x128xf32>
    %13 = vector.shape_cast %12 : vector<1x8x128xf32> to vector<8x128xf32>
    %14 = vector.extract_strided_slice %4 {offsets = [3, 0, 0], sizes = [1, 8, 128], strides = [1, 1, 1]} : vector<6x8x128xf32> to vector<1x8x128xf32>
    %15 = vector.shape_cast %14 : vector<1x8x128xf32> to vector<8x128xf32>
    %16 = vector.extract_strided_slice %4 {offsets = [4, 0, 0], sizes = [1, 8, 128], strides = [1, 1, 1]} : vector<6x8x128xf32> to vector<1x8x128xf32>
    %17 = vector.shape_cast %16 : vector<1x8x128xf32> to vector<8x128xf32>
    %18 = vector.extract_strided_slice %4 {offsets = [5, 0, 0], sizes = [1, 8, 128], strides = [1, 1, 1]} : vector<6x8x128xf32> to vector<1x8x128xf32>
    %19 = vector.shape_cast %18 : vector<1x8x128xf32> to vector<8x128xf32>
    %c0_6 = arith.constant 0 : index
    %20 = memref.load %arg1[%c0_6] : memref<54xf32, #tpu.memory_space<smem>>
    %21 = vector.broadcast %20 : f32 to vector<8x128xf32>
    %22 = arith.mulf %21, %9 : vector<8x128xf32>
    %c9 = arith.constant 9 : index
    %23 = memref.load %arg1[%c9] : memref<54xf32, #tpu.memory_space<smem>>
    %24 = vector.broadcast %23 : f32 to vector<8x128xf32>
    %25 = arith.mulf %24, %11 : vector<8x128xf32>
    %26 = arith.addf %22, %25 : vector<8x128xf32>
    %c18 = arith.constant 18 : index
    %27 = memref.load %arg1[%c18] : memref<54xf32, #tpu.memory_space<smem>>
    %28 = vector.broadcast %27 : f32 to vector<8x128xf32>
    %29 = arith.mulf %28, %13 : vector<8x128xf32>
    %30 = arith.addf %26, %29 : vector<8x128xf32>
    %c27 = arith.constant 27 : index
    %31 = memref.load %arg1[%c27] : memref<54xf32, #tpu.memory_space<smem>>
    %32 = vector.broadcast %31 : f32 to vector<8x128xf32>
    %33 = arith.mulf %32, %15 : vector<8x128xf32>
    %34 = arith.addf %30, %33 : vector<8x128xf32>
    %c36 = arith.constant 36 : index
    %35 = memref.load %arg1[%c36] : memref<54xf32, #tpu.memory_space<smem>>
    %36 = vector.broadcast %35 : f32 to vector<8x128xf32>
    %37 = arith.mulf %36, %17 : vector<8x128xf32>
    %38 = arith.addf %34, %37 : vector<8x128xf32>
    %c45 = arith.constant 45 : index
    %39 = memref.load %arg1[%c45] : memref<54xf32, #tpu.memory_space<smem>>
    %40 = vector.broadcast %39 : f32 to vector<8x128xf32>
    %41 = arith.mulf %40, %19 : vector<8x128xf32>
    %42 = arith.addf %38, %41 : vector<8x128xf32>
    %c1 = arith.constant 1 : index
    %43 = memref.load %arg1[%c1] : memref<54xf32, #tpu.memory_space<smem>>
    %44 = vector.broadcast %43 : f32 to vector<8x128xf32>
    %45 = arith.mulf %44, %9 : vector<8x128xf32>
    %c10 = arith.constant 10 : index
    %46 = memref.load %arg1[%c10] : memref<54xf32, #tpu.memory_space<smem>>
    %47 = vector.broadcast %46 : f32 to vector<8x128xf32>
    %48 = arith.mulf %47, %11 : vector<8x128xf32>
    %49 = arith.addf %45, %48 : vector<8x128xf32>
    %c19 = arith.constant 19 : index
    %50 = memref.load %arg1[%c19] : memref<54xf32, #tpu.memory_space<smem>>
    %51 = vector.broadcast %50 : f32 to vector<8x128xf32>
    %52 = arith.mulf %51, %13 : vector<8x128xf32>
    %53 = arith.addf %49, %52 : vector<8x128xf32>
    %c28 = arith.constant 28 : index
    %54 = memref.load %arg1[%c28] : memref<54xf32, #tpu.memory_space<smem>>
    %55 = vector.broadcast %54 : f32 to vector<8x128xf32>
    %56 = arith.mulf %55, %15 : vector<8x128xf32>
    %57 = arith.addf %53, %56 : vector<8x128xf32>
    %c37 = arith.constant 37 : index
    %58 = memref.load %arg1[%c37] : memref<54xf32, #tpu.memory_space<smem>>
    %59 = vector.broadcast %58 : f32 to vector<8x128xf32>
    %60 = arith.mulf %59, %17 : vector<8x128xf32>
    %61 = arith.addf %57, %60 : vector<8x128xf32>
    %c46 = arith.constant 46 : index
    %62 = memref.load %arg1[%c46] : memref<54xf32, #tpu.memory_space<smem>>
    %63 = vector.broadcast %62 : f32 to vector<8x128xf32>
    %64 = arith.mulf %63, %19 : vector<8x128xf32>
    %65 = arith.addf %61, %64 : vector<8x128xf32>
    %c2 = arith.constant 2 : index
    %66 = memref.load %arg1[%c2] : memref<54xf32, #tpu.memory_space<smem>>
    %67 = vector.broadcast %66 : f32 to vector<8x128xf32>
    %68 = arith.mulf %67, %9 : vector<8x128xf32>
    %c11 = arith.constant 11 : index
    %69 = memref.load %arg1[%c11] : memref<54xf32, #tpu.memory_space<smem>>
    %70 = vector.broadcast %69 : f32 to vector<8x128xf32>
    %71 = arith.mulf %70, %11 : vector<8x128xf32>
    %72 = arith.addf %68, %71 : vector<8x128xf32>
    %c20 = arith.constant 20 : index
    %73 = memref.load %arg1[%c20] : memref<54xf32, #tpu.memory_space<smem>>
    %74 = vector.broadcast %73 : f32 to vector<8x128xf32>
    %75 = arith.mulf %74, %13 : vector<8x128xf32>
    %76 = arith.addf %72, %75 : vector<8x128xf32>
    %c29 = arith.constant 29 : index
    %77 = memref.load %arg1[%c29] : memref<54xf32, #tpu.memory_space<smem>>
    %78 = vector.broadcast %77 : f32 to vector<8x128xf32>
    %79 = arith.mulf %78, %15 : vector<8x128xf32>
    %80 = arith.addf %76, %79 : vector<8x128xf32>
    %c38 = arith.constant 38 : index
    %81 = memref.load %arg1[%c38] : memref<54xf32, #tpu.memory_space<smem>>
    %82 = vector.broadcast %81 : f32 to vector<8x128xf32>
    %83 = arith.mulf %82, %17 : vector<8x128xf32>
    %84 = arith.addf %80, %83 : vector<8x128xf32>
    %c47 = arith.constant 47 : index
    %85 = memref.load %arg1[%c47] : memref<54xf32, #tpu.memory_space<smem>>
    %86 = vector.broadcast %85 : f32 to vector<8x128xf32>
    %87 = arith.mulf %86, %19 : vector<8x128xf32>
    %88 = arith.addf %84, %87 : vector<8x128xf32>
    %c3 = arith.constant 3 : index
    %89 = memref.load %arg1[%c3] : memref<54xf32, #tpu.memory_space<smem>>
    %90 = vector.broadcast %89 : f32 to vector<8x128xf32>
    %91 = arith.mulf %90, %9 : vector<8x128xf32>
    %c12 = arith.constant 12 : index
    %92 = memref.load %arg1[%c12] : memref<54xf32, #tpu.memory_space<smem>>
    %93 = vector.broadcast %92 : f32 to vector<8x128xf32>
    %94 = arith.mulf %93, %11 : vector<8x128xf32>
    %95 = arith.addf %91, %94 : vector<8x128xf32>
    %c21 = arith.constant 21 : index
    %96 = memref.load %arg1[%c21] : memref<54xf32, #tpu.memory_space<smem>>
    %97 = vector.broadcast %96 : f32 to vector<8x128xf32>
    %98 = arith.mulf %97, %13 : vector<8x128xf32>
    %99 = arith.addf %95, %98 : vector<8x128xf32>
    %c30 = arith.constant 30 : index
    %100 = memref.load %arg1[%c30] : memref<54xf32, #tpu.memory_space<smem>>
    %101 = vector.broadcast %100 : f32 to vector<8x128xf32>
    %102 = arith.mulf %101, %15 : vector<8x128xf32>
    %103 = arith.addf %99, %102 : vector<8x128xf32>
    %c39 = arith.constant 39 : index
    %104 = memref.load %arg1[%c39] : memref<54xf32, #tpu.memory_space<smem>>
    %105 = vector.broadcast %104 : f32 to vector<8x128xf32>
    %106 = arith.mulf %105, %17 : vector<8x128xf32>
    %107 = arith.addf %103, %106 : vector<8x128xf32>
    %c48 = arith.constant 48 : index
    %108 = memref.load %arg1[%c48] : memref<54xf32, #tpu.memory_space<smem>>
    %109 = vector.broadcast %108 : f32 to vector<8x128xf32>
    %110 = arith.mulf %109, %19 : vector<8x128xf32>
    %111 = arith.addf %107, %110 : vector<8x128xf32>
    %c4 = arith.constant 4 : index
    %112 = memref.load %arg1[%c4] : memref<54xf32, #tpu.memory_space<smem>>
    %113 = vector.broadcast %112 : f32 to vector<8x128xf32>
    %114 = arith.mulf %113, %9 : vector<8x128xf32>
    %c13 = arith.constant 13 : index
    %115 = memref.load %arg1[%c13] : memref<54xf32, #tpu.memory_space<smem>>
    %116 = vector.broadcast %115 : f32 to vector<8x128xf32>
    %117 = arith.mulf %116, %11 : vector<8x128xf32>
    %118 = arith.addf %114, %117 : vector<8x128xf32>
    %c22 = arith.constant 22 : index
    %119 = memref.load %arg1[%c22] : memref<54xf32, #tpu.memory_space<smem>>
    %120 = vector.broadcast %119 : f32 to vector<8x128xf32>
    %121 = arith.mulf %120, %13 : vector<8x128xf32>
    %122 = arith.addf %118, %121 : vector<8x128xf32>
    %c31 = arith.constant 31 : index
    %123 = memref.load %arg1[%c31] : memref<54xf32, #tpu.memory_space<smem>>
    %124 = vector.broadcast %123 : f32 to vector<8x128xf32>
    %125 = arith.mulf %124, %15 : vector<8x128xf32>
    %126 = arith.addf %122, %125 : vector<8x128xf32>
    %c40 = arith.constant 40 : index
    %127 = memref.load %arg1[%c40] : memref<54xf32, #tpu.memory_space<smem>>
    %128 = vector.broadcast %127 : f32 to vector<8x128xf32>
    %129 = arith.mulf %128, %17 : vector<8x128xf32>
    %130 = arith.addf %126, %129 : vector<8x128xf32>
    %c49 = arith.constant 49 : index
    %131 = memref.load %arg1[%c49] : memref<54xf32, #tpu.memory_space<smem>>
    %132 = vector.broadcast %131 : f32 to vector<8x128xf32>
    %133 = arith.mulf %132, %19 : vector<8x128xf32>
    %134 = arith.addf %130, %133 : vector<8x128xf32>
    %c5 = arith.constant 5 : index
    %135 = memref.load %arg1[%c5] : memref<54xf32, #tpu.memory_space<smem>>
    %136 = vector.broadcast %135 : f32 to vector<8x128xf32>
    %137 = arith.mulf %136, %9 : vector<8x128xf32>
    %c14 = arith.constant 14 : index
    %138 = memref.load %arg1[%c14] : memref<54xf32, #tpu.memory_space<smem>>
    %139 = vector.broadcast %138 : f32 to vector<8x128xf32>
    %140 = arith.mulf %139, %11 : vector<8x128xf32>
    %141 = arith.addf %137, %140 : vector<8x128xf32>
    %c23 = arith.constant 23 : index
    %142 = memref.load %arg1[%c23] : memref<54xf32, #tpu.memory_space<smem>>
    %143 = vector.broadcast %142 : f32 to vector<8x128xf32>
    %144 = arith.mulf %143, %13 : vector<8x128xf32>
    %145 = arith.addf %141, %144 : vector<8x128xf32>
    %c32 = arith.constant 32 : index
    %146 = memref.load %arg1[%c32] : memref<54xf32, #tpu.memory_space<smem>>
    %147 = vector.broadcast %146 : f32 to vector<8x128xf32>
    %148 = arith.mulf %147, %15 : vector<8x128xf32>
    %149 = arith.addf %145, %148 : vector<8x128xf32>
    %c41 = arith.constant 41 : index
    %150 = memref.load %arg1[%c41] : memref<54xf32, #tpu.memory_space<smem>>
    %151 = vector.broadcast %150 : f32 to vector<8x128xf32>
    %152 = arith.mulf %151, %17 : vector<8x128xf32>
    %153 = arith.addf %149, %152 : vector<8x128xf32>
    %c50 = arith.constant 50 : index
    %154 = memref.load %arg1[%c50] : memref<54xf32, #tpu.memory_space<smem>>
    %155 = vector.broadcast %154 : f32 to vector<8x128xf32>
    %156 = arith.mulf %155, %19 : vector<8x128xf32>
    %157 = arith.addf %153, %156 : vector<8x128xf32>
    %c6 = arith.constant 6 : index
    %158 = memref.load %arg1[%c6] : memref<54xf32, #tpu.memory_space<smem>>
    %159 = vector.broadcast %158 : f32 to vector<8x128xf32>
    %160 = arith.mulf %159, %9 : vector<8x128xf32>
    %c15 = arith.constant 15 : index
    %161 = memref.load %arg1[%c15] : memref<54xf32, #tpu.memory_space<smem>>
    %162 = vector.broadcast %161 : f32 to vector<8x128xf32>
    %163 = arith.mulf %162, %11 : vector<8x128xf32>
    %164 = arith.addf %160, %163 : vector<8x128xf32>
    %c24 = arith.constant 24 : index
    %165 = memref.load %arg1[%c24] : memref<54xf32, #tpu.memory_space<smem>>
    %166 = vector.broadcast %165 : f32 to vector<8x128xf32>
    %167 = arith.mulf %166, %13 : vector<8x128xf32>
    %168 = arith.addf %164, %167 : vector<8x128xf32>
    %c33 = arith.constant 33 : index
    %169 = memref.load %arg1[%c33] : memref<54xf32, #tpu.memory_space<smem>>
    %170 = vector.broadcast %169 : f32 to vector<8x128xf32>
    %171 = arith.mulf %170, %15 : vector<8x128xf32>
    %172 = arith.addf %168, %171 : vector<8x128xf32>
    %c42 = arith.constant 42 : index
    %173 = memref.load %arg1[%c42] : memref<54xf32, #tpu.memory_space<smem>>
    %174 = vector.broadcast %173 : f32 to vector<8x128xf32>
    %175 = arith.mulf %174, %17 : vector<8x128xf32>
    %176 = arith.addf %172, %175 : vector<8x128xf32>
    %c51 = arith.constant 51 : index
    %177 = memref.load %arg1[%c51] : memref<54xf32, #tpu.memory_space<smem>>
    %178 = vector.broadcast %177 : f32 to vector<8x128xf32>
    %179 = arith.mulf %178, %19 : vector<8x128xf32>
    %180 = arith.addf %176, %179 : vector<8x128xf32>
    %c7 = arith.constant 7 : index
    %181 = memref.load %arg1[%c7] : memref<54xf32, #tpu.memory_space<smem>>
    %182 = vector.broadcast %181 : f32 to vector<8x128xf32>
    %183 = arith.mulf %182, %9 : vector<8x128xf32>
    %c16 = arith.constant 16 : index
    %184 = memref.load %arg1[%c16] : memref<54xf32, #tpu.memory_space<smem>>
    %185 = vector.broadcast %184 : f32 to vector<8x128xf32>
    %186 = arith.mulf %185, %11 : vector<8x128xf32>
    %187 = arith.addf %183, %186 : vector<8x128xf32>
    %c25 = arith.constant 25 : index
    %188 = memref.load %arg1[%c25] : memref<54xf32, #tpu.memory_space<smem>>
    %189 = vector.broadcast %188 : f32 to vector<8x128xf32>
    %190 = arith.mulf %189, %13 : vector<8x128xf32>
    %191 = arith.addf %187, %190 : vector<8x128xf32>
    %c34 = arith.constant 34 : index
    %192 = memref.load %arg1[%c34] : memref<54xf32, #tpu.memory_space<smem>>
    %193 = vector.broadcast %192 : f32 to vector<8x128xf32>
    %194 = arith.mulf %193, %15 : vector<8x128xf32>
    %195 = arith.addf %191, %194 : vector<8x128xf32>
    %c43 = arith.constant 43 : index
    %196 = memref.load %arg1[%c43] : memref<54xf32, #tpu.memory_space<smem>>
    %197 = vector.broadcast %196 : f32 to vector<8x128xf32>
    %198 = arith.mulf %197, %17 : vector<8x128xf32>
    %199 = arith.addf %195, %198 : vector<8x128xf32>
    %c52 = arith.constant 52 : index
    %200 = memref.load %arg1[%c52] : memref<54xf32, #tpu.memory_space<smem>>
    %201 = vector.broadcast %200 : f32 to vector<8x128xf32>
    %202 = arith.mulf %201, %19 : vector<8x128xf32>
    %203 = arith.addf %199, %202 : vector<8x128xf32>
    %c8 = arith.constant 8 : index
    %204 = memref.load %arg1[%c8] : memref<54xf32, #tpu.memory_space<smem>>
    %205 = vector.broadcast %204 : f32 to vector<8x128xf32>
    %206 = arith.mulf %205, %9 : vector<8x128xf32>
    %c17 = arith.constant 17 : index
    %207 = memref.load %arg1[%c17] : memref<54xf32, #tpu.memory_space<smem>>
    %208 = vector.broadcast %207 : f32 to vector<8x128xf32>
    %209 = arith.mulf %208, %11 : vector<8x128xf32>
    %210 = arith.addf %206, %209 : vector<8x128xf32>
    %c26 = arith.constant 26 : index
    %211 = memref.load %arg1[%c26] : memref<54xf32, #tpu.memory_space<smem>>
    %212 = vector.broadcast %211 : f32 to vector<8x128xf32>
    %213 = arith.mulf %212, %13 : vector<8x128xf32>
    %214 = arith.addf %210, %213 : vector<8x128xf32>
    %c35 = arith.constant 35 : index
    %215 = memref.load %arg1[%c35] : memref<54xf32, #tpu.memory_space<smem>>
    %216 = vector.broadcast %215 : f32 to vector<8x128xf32>
    %217 = arith.mulf %216, %15 : vector<8x128xf32>
    %218 = arith.addf %214, %217 : vector<8x128xf32>
    %c44 = arith.constant 44 : index
    %219 = memref.load %arg1[%c44] : memref<54xf32, #tpu.memory_space<smem>>
    %220 = vector.broadcast %219 : f32 to vector<8x128xf32>
    %221 = arith.mulf %220, %17 : vector<8x128xf32>
    %222 = arith.addf %218, %221 : vector<8x128xf32>
    %c53 = arith.constant 53 : index
    %223 = memref.load %arg1[%c53] : memref<54xf32, #tpu.memory_space<smem>>
    %224 = vector.broadcast %223 : f32 to vector<8x128xf32>
    %225 = arith.mulf %224, %19 : vector<8x128xf32>
    %226 = arith.addf %222, %225 : vector<8x128xf32>
    %227 = math.absf %42 : vector<8x128xf32>
    %228 = math.absf %65 : vector<8x128xf32>
    %229 = arith.addf %227, %228 : vector<8x128xf32>
    %230 = math.absf %88 : vector<8x128xf32>
    %231 = arith.addf %229, %230 : vector<8x128xf32>
    %232 = math.absf %111 : vector<8x128xf32>
    %233 = math.absf %134 : vector<8x128xf32>
    %234 = arith.addf %232, %233 : vector<8x128xf32>
    %235 = math.absf %157 : vector<8x128xf32>
    %236 = arith.addf %234, %235 : vector<8x128xf32>
    %237 = arith.maximumf %231, %236 : vector<8x128xf32>
    %238 = math.absf %180 : vector<8x128xf32>
    %239 = math.absf %203 : vector<8x128xf32>
    %240 = arith.addf %238, %239 : vector<8x128xf32>
    %241 = math.absf %226 : vector<8x128xf32>
    %242 = arith.addf %240, %241 : vector<8x128xf32>
    %243 = arith.maximumf %237, %242 : vector<8x128xf32>
    %244 = tpu.bitcast %243 : vector<8x128xf32> -> vector<8x128xi32>
    %c23_i32 = arith.constant 23 : i32
    %245 = vector.broadcast %c23_i32 : i32 to vector<8x128xi32>
    %246 = arith.shrsi %244, %245 : vector<8x128xi32>
    %c255_i32 = arith.constant 255 : i32
    %247 = vector.broadcast %c255_i32 : i32 to vector<8x128xi32>
    %248 = arith.andi %246, %247 : vector<8x128xi32>
    %c125_i32 = arith.constant 125 : i32
    %249 = vector.broadcast %c125_i32 : i32 to vector<8x128xi32>
    %250 = arith.subi %248, %249 : vector<8x128xi32>
    %c0_i32_7 = arith.constant 0 : i32
    %c60_i32 = arith.constant 60 : i32
    %251 = vector.broadcast %c0_i32_7 : i32 to vector<8x128xi32>
    %252 = arith.maxsi %251, %250 : vector<8x128xi32>
    %253 = vector.broadcast %c60_i32 : i32 to vector<8x128xi32>
    %254 = arith.minsi %253, %252 : vector<8x128xi32>
    %c127_i32 = arith.constant 127 : i32
    %255 = vector.broadcast %c127_i32 : i32 to vector<8x128xi32>
    %256 = arith.subi %255, %254 : vector<8x128xi32>
    %c23_i32_8 = arith.constant 23 : i32
    %257 = vector.broadcast %c23_i32_8 : i32 to vector<8x128xi32>
    %258 = arith.shli %256, %257 : vector<8x128xi32>
    %259 = tpu.bitcast %258 : vector<8x128xi32> -> vector<8x128xf32>
    %260 = arith.mulf %42, %259 : vector<8x128xf32>
    %261 = arith.mulf %65, %259 : vector<8x128xf32>
    %262 = arith.mulf %88, %259 : vector<8x128xf32>
    %263 = arith.mulf %111, %259 : vector<8x128xf32>
    %264 = arith.mulf %134, %259 : vector<8x128xf32>
    %265 = arith.mulf %157, %259 : vector<8x128xf32>
    %266 = arith.mulf %180, %259 : vector<8x128xf32>
    %267 = arith.mulf %203, %259 : vector<8x128xf32>
    %268 = arith.mulf %226, %259 : vector<8x128xf32>
    %cst = arith.constant 1.250000e-01 : f32
    %269 = vector.broadcast %cst : f32 to vector<8x128xf32>
    %270 = arith.mulf %260, %269 : vector<8x128xf32>
    %cst_9 = arith.constant 1.000000e+00 : f32
    %271 = vector.broadcast %cst_9 : f32 to vector<8x128xf32>
    %272 = arith.addf %270, %271 : vector<8x128xf32>
    %cst_10 = arith.constant 1.250000e-01 : f32
    %273 = vector.broadcast %cst_10 : f32 to vector<8x128xf32>
    %274 = arith.mulf %261, %273 : vector<8x128xf32>
    %cst_11 = arith.constant 1.250000e-01 : f32
    %275 = vector.broadcast %cst_11 : f32 to vector<8x128xf32>
    %276 = arith.mulf %262, %275 : vector<8x128xf32>
    %cst_12 = arith.constant 1.250000e-01 : f32
    %277 = vector.broadcast %cst_12 : f32 to vector<8x128xf32>
    %278 = arith.mulf %263, %277 : vector<8x128xf32>
    %cst_13 = arith.constant 1.250000e-01 : f32
    %279 = vector.broadcast %cst_13 : f32 to vector<8x128xf32>
    %280 = arith.mulf %264, %279 : vector<8x128xf32>
    %cst_14 = arith.constant 1.000000e+00 : f32
    %281 = vector.broadcast %cst_14 : f32 to vector<8x128xf32>
    %282 = arith.addf %280, %281 : vector<8x128xf32>
    %cst_15 = arith.constant 1.250000e-01 : f32
    %283 = vector.broadcast %cst_15 : f32 to vector<8x128xf32>
    %284 = arith.mulf %265, %283 : vector<8x128xf32>
    %cst_16 = arith.constant 1.250000e-01 : f32
    %285 = vector.broadcast %cst_16 : f32 to vector<8x128xf32>
    %286 = arith.mulf %266, %285 : vector<8x128xf32>
    %cst_17 = arith.constant 1.250000e-01 : f32
    %287 = vector.broadcast %cst_17 : f32 to vector<8x128xf32>
    %288 = arith.mulf %267, %287 : vector<8x128xf32>
    %cst_18 = arith.constant 1.250000e-01 : f32
    %289 = vector.broadcast %cst_18 : f32 to vector<8x128xf32>
    %290 = arith.mulf %268, %289 : vector<8x128xf32>
    %cst_19 = arith.constant 1.000000e+00 : f32
    %291 = vector.broadcast %cst_19 : f32 to vector<8x128xf32>
    %292 = arith.addf %290, %291 : vector<8x128xf32>
    %293 = arith.mulf %260, %272 : vector<8x128xf32>
    %294 = arith.mulf %261, %278 : vector<8x128xf32>
    %295 = arith.addf %293, %294 : vector<8x128xf32>
    %296 = arith.mulf %262, %286 : vector<8x128xf32>
    %297 = arith.addf %295, %296 : vector<8x128xf32>
    %298 = arith.mulf %260, %274 : vector<8x128xf32>
    %299 = arith.mulf %261, %282 : vector<8x128xf32>
    %300 = arith.addf %298, %299 : vector<8x128xf32>
    %301 = arith.mulf %262, %288 : vector<8x128xf32>
    %302 = arith.addf %300, %301 : vector<8x128xf32>
    %303 = arith.mulf %260, %276 : vector<8x128xf32>
    %304 = arith.mulf %261, %284 : vector<8x128xf32>
    %305 = arith.addf %303, %304 : vector<8x128xf32>
    %306 = arith.mulf %262, %292 : vector<8x128xf32>
    %307 = arith.addf %305, %306 : vector<8x128xf32>
    %308 = arith.mulf %263, %272 : vector<8x128xf32>
    %309 = arith.mulf %264, %278 : vector<8x128xf32>
    %310 = arith.addf %308, %309 : vector<8x128xf32>
    %311 = arith.mulf %265, %286 : vector<8x128xf32>
    %312 = arith.addf %310, %311 : vector<8x128xf32>
    %313 = arith.mulf %263, %274 : vector<8x128xf32>
    %314 = arith.mulf %264, %282 : vector<8x128xf32>
    %315 = arith.addf %313, %314 : vector<8x128xf32>
    %316 = arith.mulf %265, %288 : vector<8x128xf32>
    %317 = arith.addf %315, %316 : vector<8x128xf32>
    %318 = arith.mulf %263, %276 : vector<8x128xf32>
    %319 = arith.mulf %264, %284 : vector<8x128xf32>
    %320 = arith.addf %318, %319 : vector<8x128xf32>
    %321 = arith.mulf %265, %292 : vector<8x128xf32>
    %322 = arith.addf %320, %321 : vector<8x128xf32>
    %323 = arith.mulf %266, %272 : vector<8x128xf32>
    %324 = arith.mulf %267, %278 : vector<8x128xf32>
    %325 = arith.addf %323, %324 : vector<8x128xf32>
    %326 = arith.mulf %268, %286 : vector<8x128xf32>
    %327 = arith.addf %325, %326 : vector<8x128xf32>
    %328 = arith.mulf %266, %274 : vector<8x128xf32>
    %329 = arith.mulf %267, %282 : vector<8x128xf32>
    %330 = arith.addf %328, %329 : vector<8x128xf32>
    %331 = arith.mulf %268, %288 : vector<8x128xf32>
    %332 = arith.addf %330, %331 : vector<8x128xf32>
    %333 = arith.mulf %266, %276 : vector<8x128xf32>
    %334 = arith.mulf %267, %284 : vector<8x128xf32>
    %335 = arith.addf %333, %334 : vector<8x128xf32>
    %336 = arith.mulf %268, %292 : vector<8x128xf32>
    %337 = arith.addf %335, %336 : vector<8x128xf32>
    %cst_20 = arith.constant 0.142857149 : f32
    %338 = vector.broadcast %cst_20 : f32 to vector<8x128xf32>
    %339 = arith.mulf %297, %338 : vector<8x128xf32>
    %cst_21 = arith.constant 1.000000e+00 : f32
    %340 = vector.broadcast %cst_21 : f32 to vector<8x128xf32>
    %341 = arith.addf %339, %340 : vector<8x128xf32>
    %cst_22 = arith.constant 0.142857149 : f32
    %342 = vector.broadcast %cst_22 : f32 to vector<8x128xf32>
    %343 = arith.mulf %302, %342 : vector<8x128xf32>
    %cst_23 = arith.constant 0.142857149 : f32
    %344 = vector.broadcast %cst_23 : f32 to vector<8x128xf32>
    %345 = arith.mulf %307, %344 : vector<8x128xf32>
    %cst_24 = arith.constant 0.142857149 : f32
    %346 = vector.broadcast %cst_24 : f32 to vector<8x128xf32>
    %347 = arith.mulf %312, %346 : vector<8x128xf32>
    %cst_25 = arith.constant 0.142857149 : f32
    %348 = vector.broadcast %cst_25 : f32 to vector<8x128xf32>
    %349 = arith.mulf %317, %348 : vector<8x128xf32>
    %cst_26 = arith.constant 1.000000e+00 : f32
    %350 = vector.broadcast %cst_26 : f32 to vector<8x128xf32>
    %351 = arith.addf %349, %350 : vector<8x128xf32>
    %cst_27 = arith.constant 0.142857149 : f32
    %352 = vector.broadcast %cst_27 : f32 to vector<8x128xf32>
    %353 = arith.mulf %322, %352 : vector<8x128xf32>
    %cst_28 = arith.constant 0.142857149 : f32
    %354 = vector.broadcast %cst_28 : f32 to vector<8x128xf32>
    %355 = arith.mulf %327, %354 : vector<8x128xf32>
    %cst_29 = arith.constant 0.142857149 : f32
    %356 = vector.broadcast %cst_29 : f32 to vector<8x128xf32>
    %357 = arith.mulf %332, %356 : vector<8x128xf32>
    %cst_30 = arith.constant 0.142857149 : f32
    %358 = vector.broadcast %cst_30 : f32 to vector<8x128xf32>
    %359 = arith.mulf %337, %358 : vector<8x128xf32>
    %cst_31 = arith.constant 1.000000e+00 : f32
    %360 = vector.broadcast %cst_31 : f32 to vector<8x128xf32>
    %361 = arith.addf %359, %360 : vector<8x128xf32>
    %362 = arith.mulf %260, %341 : vector<8x128xf32>
    %363 = arith.mulf %261, %347 : vector<8x128xf32>
    %364 = arith.addf %362, %363 : vector<8x128xf32>
    %365 = arith.mulf %262, %355 : vector<8x128xf32>
    %366 = arith.addf %364, %365 : vector<8x128xf32>
    %367 = arith.mulf %260, %343 : vector<8x128xf32>
    %368 = arith.mulf %261, %351 : vector<8x128xf32>
    %369 = arith.addf %367, %368 : vector<8x128xf32>
    %370 = arith.mulf %262, %357 : vector<8x128xf32>
    %371 = arith.addf %369, %370 : vector<8x128xf32>
    %372 = arith.mulf %260, %345 : vector<8x128xf32>
    %373 = arith.mulf %261, %353 : vector<8x128xf32>
    %374 = arith.addf %372, %373 : vector<8x128xf32>
    %375 = arith.mulf %262, %361 : vector<8x128xf32>
    %376 = arith.addf %374, %375 : vector<8x128xf32>
    %377 = arith.mulf %263, %341 : vector<8x128xf32>
    %378 = arith.mulf %264, %347 : vector<8x128xf32>
    %379 = arith.addf %377, %378 : vector<8x128xf32>
    %380 = arith.mulf %265, %355 : vector<8x128xf32>
    %381 = arith.addf %379, %380 : vector<8x128xf32>
    %382 = arith.mulf %263, %343 : vector<8x128xf32>
    %383 = arith.mulf %264, %351 : vector<8x128xf32>
    %384 = arith.addf %382, %383 : vector<8x128xf32>
    %385 = arith.mulf %265, %357 : vector<8x128xf32>
    %386 = arith.addf %384, %385 : vector<8x128xf32>
    %387 = arith.mulf %263, %345 : vector<8x128xf32>
    %388 = arith.mulf %264, %353 : vector<8x128xf32>
    %389 = arith.addf %387, %388 : vector<8x128xf32>
    %390 = arith.mulf %265, %361 : vector<8x128xf32>
    %391 = arith.addf %389, %390 : vector<8x128xf32>
    %392 = arith.mulf %266, %341 : vector<8x128xf32>
    %393 = arith.mulf %267, %347 : vector<8x128xf32>
    %394 = arith.addf %392, %393 : vector<8x128xf32>
    %395 = arith.mulf %268, %355 : vector<8x128xf32>
    %396 = arith.addf %394, %395 : vector<8x128xf32>
    %397 = arith.mulf %266, %343 : vector<8x128xf32>
    %398 = arith.mulf %267, %351 : vector<8x128xf32>
    %399 = arith.addf %397, %398 : vector<8x128xf32>
    %400 = arith.mulf %268, %357 : vector<8x128xf32>
    %401 = arith.addf %399, %400 : vector<8x128xf32>
    %402 = arith.mulf %266, %345 : vector<8x128xf32>
    %403 = arith.mulf %267, %353 : vector<8x128xf32>
    %404 = arith.addf %402, %403 : vector<8x128xf32>
    %405 = arith.mulf %268, %361 : vector<8x128xf32>
    %406 = arith.addf %404, %405 : vector<8x128xf32>
    %cst_32 = arith.constant 0.166666672 : f32
    %407 = vector.broadcast %cst_32 : f32 to vector<8x128xf32>
    %408 = arith.mulf %366, %407 : vector<8x128xf32>
    %cst_33 = arith.constant 1.000000e+00 : f32
    %409 = vector.broadcast %cst_33 : f32 to vector<8x128xf32>
    %410 = arith.addf %408, %409 : vector<8x128xf32>
    %cst_34 = arith.constant 0.166666672 : f32
    %411 = vector.broadcast %cst_34 : f32 to vector<8x128xf32>
    %412 = arith.mulf %371, %411 : vector<8x128xf32>
    %cst_35 = arith.constant 0.166666672 : f32
    %413 = vector.broadcast %cst_35 : f32 to vector<8x128xf32>
    %414 = arith.mulf %376, %413 : vector<8x128xf32>
    %cst_36 = arith.constant 0.166666672 : f32
    %415 = vector.broadcast %cst_36 : f32 to vector<8x128xf32>
    %416 = arith.mulf %381, %415 : vector<8x128xf32>
    %cst_37 = arith.constant 0.166666672 : f32
    %417 = vector.broadcast %cst_37 : f32 to vector<8x128xf32>
    %418 = arith.mulf %386, %417 : vector<8x128xf32>
    %cst_38 = arith.constant 1.000000e+00 : f32
    %419 = vector.broadcast %cst_38 : f32 to vector<8x128xf32>
    %420 = arith.addf %418, %419 : vector<8x128xf32>
    %cst_39 = arith.constant 0.166666672 : f32
    %421 = vector.broadcast %cst_39 : f32 to vector<8x128xf32>
    %422 = arith.mulf %391, %421 : vector<8x128xf32>
    %cst_40 = arith.constant 0.166666672 : f32
    %423 = vector.broadcast %cst_40 : f32 to vector<8x128xf32>
    %424 = arith.mulf %396, %423 : vector<8x128xf32>
    %cst_41 = arith.constant 0.166666672 : f32
    %425 = vector.broadcast %cst_41 : f32 to vector<8x128xf32>
    %426 = arith.mulf %401, %425 : vector<8x128xf32>
    %cst_42 = arith.constant 0.166666672 : f32
    %427 = vector.broadcast %cst_42 : f32 to vector<8x128xf32>
    %428 = arith.mulf %406, %427 : vector<8x128xf32>
    %cst_43 = arith.constant 1.000000e+00 : f32
    %429 = vector.broadcast %cst_43 : f32 to vector<8x128xf32>
    %430 = arith.addf %428, %429 : vector<8x128xf32>
    %431 = arith.mulf %260, %410 : vector<8x128xf32>
    %432 = arith.mulf %261, %416 : vector<8x128xf32>
    %433 = arith.addf %431, %432 : vector<8x128xf32>
    %434 = arith.mulf %262, %424 : vector<8x128xf32>
    %435 = arith.addf %433, %434 : vector<8x128xf32>
    %436 = arith.mulf %260, %412 : vector<8x128xf32>
    %437 = arith.mulf %261, %420 : vector<8x128xf32>
    %438 = arith.addf %436, %437 : vector<8x128xf32>
    %439 = arith.mulf %262, %426 : vector<8x128xf32>
    %440 = arith.addf %438, %439 : vector<8x128xf32>
    %441 = arith.mulf %260, %414 : vector<8x128xf32>
    %442 = arith.mulf %261, %422 : vector<8x128xf32>
    %443 = arith.addf %441, %442 : vector<8x128xf32>
    %444 = arith.mulf %262, %430 : vector<8x128xf32>
    %445 = arith.addf %443, %444 : vector<8x128xf32>
    %446 = arith.mulf %263, %410 : vector<8x128xf32>
    %447 = arith.mulf %264, %416 : vector<8x128xf32>
    %448 = arith.addf %446, %447 : vector<8x128xf32>
    %449 = arith.mulf %265, %424 : vector<8x128xf32>
    %450 = arith.addf %448, %449 : vector<8x128xf32>
    %451 = arith.mulf %263, %412 : vector<8x128xf32>
    %452 = arith.mulf %264, %420 : vector<8x128xf32>
    %453 = arith.addf %451, %452 : vector<8x128xf32>
    %454 = arith.mulf %265, %426 : vector<8x128xf32>
    %455 = arith.addf %453, %454 : vector<8x128xf32>
    %456 = arith.mulf %263, %414 : vector<8x128xf32>
    %457 = arith.mulf %264, %422 : vector<8x128xf32>
    %458 = arith.addf %456, %457 : vector<8x128xf32>
    %459 = arith.mulf %265, %430 : vector<8x128xf32>
    %460 = arith.addf %458, %459 : vector<8x128xf32>
    %461 = arith.mulf %266, %410 : vector<8x128xf32>
    %462 = arith.mulf %267, %416 : vector<8x128xf32>
    %463 = arith.addf %461, %462 : vector<8x128xf32>
    %464 = arith.mulf %268, %424 : vector<8x128xf32>
    %465 = arith.addf %463, %464 : vector<8x128xf32>
    %466 = arith.mulf %266, %412 : vector<8x128xf32>
    %467 = arith.mulf %267, %420 : vector<8x128xf32>
    %468 = arith.addf %466, %467 : vector<8x128xf32>
    %469 = arith.mulf %268, %426 : vector<8x128xf32>
    %470 = arith.addf %468, %469 : vector<8x128xf32>
    %471 = arith.mulf %266, %414 : vector<8x128xf32>
    %472 = arith.mulf %267, %422 : vector<8x128xf32>
    %473 = arith.addf %471, %472 : vector<8x128xf32>
    %474 = arith.mulf %268, %430 : vector<8x128xf32>
    %475 = arith.addf %473, %474 : vector<8x128xf32>
    %cst_44 = arith.constant 2.000000e-01 : f32
    %476 = vector.broadcast %cst_44 : f32 to vector<8x128xf32>
    %477 = arith.mulf %435, %476 : vector<8x128xf32>
    %cst_45 = arith.constant 1.000000e+00 : f32
    %478 = vector.broadcast %cst_45 : f32 to vector<8x128xf32>
    %479 = arith.addf %477, %478 : vector<8x128xf32>
    %cst_46 = arith.constant 2.000000e-01 : f32
    %480 = vector.broadcast %cst_46 : f32 to vector<8x128xf32>
    %481 = arith.mulf %440, %480 : vector<8x128xf32>
    %cst_47 = arith.constant 2.000000e-01 : f32
    %482 = vector.broadcast %cst_47 : f32 to vector<8x128xf32>
    %483 = arith.mulf %445, %482 : vector<8x128xf32>
    %cst_48 = arith.constant 2.000000e-01 : f32
    %484 = vector.broadcast %cst_48 : f32 to vector<8x128xf32>
    %485 = arith.mulf %450, %484 : vector<8x128xf32>
    %cst_49 = arith.constant 2.000000e-01 : f32
    %486 = vector.broadcast %cst_49 : f32 to vector<8x128xf32>
    %487 = arith.mulf %455, %486 : vector<8x128xf32>
    %cst_50 = arith.constant 1.000000e+00 : f32
    %488 = vector.broadcast %cst_50 : f32 to vector<8x128xf32>
    %489 = arith.addf %487, %488 : vector<8x128xf32>
    %cst_51 = arith.constant 2.000000e-01 : f32
    %490 = vector.broadcast %cst_51 : f32 to vector<8x128xf32>
    %491 = arith.mulf %460, %490 : vector<8x128xf32>
    %cst_52 = arith.constant 2.000000e-01 : f32
    %492 = vector.broadcast %cst_52 : f32 to vector<8x128xf32>
    %493 = arith.mulf %465, %492 : vector<8x128xf32>
    %cst_53 = arith.constant 2.000000e-01 : f32
    %494 = vector.broadcast %cst_53 : f32 to vector<8x128xf32>
    %495 = arith.mulf %470, %494 : vector<8x128xf32>
    %cst_54 = arith.constant 2.000000e-01 : f32
    %496 = vector.broadcast %cst_54 : f32 to vector<8x128xf32>
    %497 = arith.mulf %475, %496 : vector<8x128xf32>
    %cst_55 = arith.constant 1.000000e+00 : f32
    %498 = vector.broadcast %cst_55 : f32 to vector<8x128xf32>
    %499 = arith.addf %497, %498 : vector<8x128xf32>
    %500 = arith.mulf %260, %479 : vector<8x128xf32>
    %501 = arith.mulf %261, %485 : vector<8x128xf32>
    %502 = arith.addf %500, %501 : vector<8x128xf32>
    %503 = arith.mulf %262, %493 : vector<8x128xf32>
    %504 = arith.addf %502, %503 : vector<8x128xf32>
    %505 = arith.mulf %260, %481 : vector<8x128xf32>
    %506 = arith.mulf %261, %489 : vector<8x128xf32>
    %507 = arith.addf %505, %506 : vector<8x128xf32>
    %508 = arith.mulf %262, %495 : vector<8x128xf32>
    %509 = arith.addf %507, %508 : vector<8x128xf32>
    %510 = arith.mulf %260, %483 : vector<8x128xf32>
    %511 = arith.mulf %261, %491 : vector<8x128xf32>
    %512 = arith.addf %510, %511 : vector<8x128xf32>
    %513 = arith.mulf %262, %499 : vector<8x128xf32>
    %514 = arith.addf %512, %513 : vector<8x128xf32>
    %515 = arith.mulf %263, %479 : vector<8x128xf32>
    %516 = arith.mulf %264, %485 : vector<8x128xf32>
    %517 = arith.addf %515, %516 : vector<8x128xf32>
    %518 = arith.mulf %265, %493 : vector<8x128xf32>
    %519 = arith.addf %517, %518 : vector<8x128xf32>
    %520 = arith.mulf %263, %481 : vector<8x128xf32>
    %521 = arith.mulf %264, %489 : vector<8x128xf32>
    %522 = arith.addf %520, %521 : vector<8x128xf32>
    %523 = arith.mulf %265, %495 : vector<8x128xf32>
    %524 = arith.addf %522, %523 : vector<8x128xf32>
    %525 = arith.mulf %263, %483 : vector<8x128xf32>
    %526 = arith.mulf %264, %491 : vector<8x128xf32>
    %527 = arith.addf %525, %526 : vector<8x128xf32>
    %528 = arith.mulf %265, %499 : vector<8x128xf32>
    %529 = arith.addf %527, %528 : vector<8x128xf32>
    %530 = arith.mulf %266, %479 : vector<8x128xf32>
    %531 = arith.mulf %267, %485 : vector<8x128xf32>
    %532 = arith.addf %530, %531 : vector<8x128xf32>
    %533 = arith.mulf %268, %493 : vector<8x128xf32>
    %534 = arith.addf %532, %533 : vector<8x128xf32>
    %535 = arith.mulf %266, %481 : vector<8x128xf32>
    %536 = arith.mulf %267, %489 : vector<8x128xf32>
    %537 = arith.addf %535, %536 : vector<8x128xf32>
    %538 = arith.mulf %268, %495 : vector<8x128xf32>
    %539 = arith.addf %537, %538 : vector<8x128xf32>
    %540 = arith.mulf %266, %483 : vector<8x128xf32>
    %541 = arith.mulf %267, %491 : vector<8x128xf32>
    %542 = arith.addf %540, %541 : vector<8x128xf32>
    %543 = arith.mulf %268, %499 : vector<8x128xf32>
    %544 = arith.addf %542, %543 : vector<8x128xf32>
    %cst_56 = arith.constant 2.500000e-01 : f32
    %545 = vector.broadcast %cst_56 : f32 to vector<8x128xf32>
    %546 = arith.mulf %504, %545 : vector<8x128xf32>
    %cst_57 = arith.constant 1.000000e+00 : f32
    %547 = vector.broadcast %cst_57 : f32 to vector<8x128xf32>
    %548 = arith.addf %546, %547 : vector<8x128xf32>
    %cst_58 = arith.constant 2.500000e-01 : f32
    %549 = vector.broadcast %cst_58 : f32 to vector<8x128xf32>
    %550 = arith.mulf %509, %549 : vector<8x128xf32>
    %cst_59 = arith.constant 2.500000e-01 : f32
    %551 = vector.broadcast %cst_59 : f32 to vector<8x128xf32>
    %552 = arith.mulf %514, %551 : vector<8x128xf32>
    %cst_60 = arith.constant 2.500000e-01 : f32
    %553 = vector.broadcast %cst_60 : f32 to vector<8x128xf32>
    %554 = arith.mulf %519, %553 : vector<8x128xf32>
    %cst_61 = arith.constant 2.500000e-01 : f32
    %555 = vector.broadcast %cst_61 : f32 to vector<8x128xf32>
    %556 = arith.mulf %524, %555 : vector<8x128xf32>
    %cst_62 = arith.constant 1.000000e+00 : f32
    %557 = vector.broadcast %cst_62 : f32 to vector<8x128xf32>
    %558 = arith.addf %556, %557 : vector<8x128xf32>
    %cst_63 = arith.constant 2.500000e-01 : f32
    %559 = vector.broadcast %cst_63 : f32 to vector<8x128xf32>
    %560 = arith.mulf %529, %559 : vector<8x128xf32>
    %cst_64 = arith.constant 2.500000e-01 : f32
    %561 = vector.broadcast %cst_64 : f32 to vector<8x128xf32>
    %562 = arith.mulf %534, %561 : vector<8x128xf32>
    %cst_65 = arith.constant 2.500000e-01 : f32
    %563 = vector.broadcast %cst_65 : f32 to vector<8x128xf32>
    %564 = arith.mulf %539, %563 : vector<8x128xf32>
    %cst_66 = arith.constant 2.500000e-01 : f32
    %565 = vector.broadcast %cst_66 : f32 to vector<8x128xf32>
    %566 = arith.mulf %544, %565 : vector<8x128xf32>
    %cst_67 = arith.constant 1.000000e+00 : f32
    %567 = vector.broadcast %cst_67 : f32 to vector<8x128xf32>
    %568 = arith.addf %566, %567 : vector<8x128xf32>
    %569 = arith.mulf %260, %548 : vector<8x128xf32>
    %570 = arith.mulf %261, %554 : vector<8x128xf32>
    %571 = arith.addf %569, %570 : vector<8x128xf32>
    %572 = arith.mulf %262, %562 : vector<8x128xf32>
    %573 = arith.addf %571, %572 : vector<8x128xf32>
    %574 = arith.mulf %260, %550 : vector<8x128xf32>
    %575 = arith.mulf %261, %558 : vector<8x128xf32>
    %576 = arith.addf %574, %575 : vector<8x128xf32>
    %577 = arith.mulf %262, %564 : vector<8x128xf32>
    %578 = arith.addf %576, %577 : vector<8x128xf32>
    %579 = arith.mulf %260, %552 : vector<8x128xf32>
    %580 = arith.mulf %261, %560 : vector<8x128xf32>
    %581 = arith.addf %579, %580 : vector<8x128xf32>
    %582 = arith.mulf %262, %568 : vector<8x128xf32>
    %583 = arith.addf %581, %582 : vector<8x128xf32>
    %584 = arith.mulf %263, %548 : vector<8x128xf32>
    %585 = arith.mulf %264, %554 : vector<8x128xf32>
    %586 = arith.addf %584, %585 : vector<8x128xf32>
    %587 = arith.mulf %265, %562 : vector<8x128xf32>
    %588 = arith.addf %586, %587 : vector<8x128xf32>
    %589 = arith.mulf %263, %550 : vector<8x128xf32>
    %590 = arith.mulf %264, %558 : vector<8x128xf32>
    %591 = arith.addf %589, %590 : vector<8x128xf32>
    %592 = arith.mulf %265, %564 : vector<8x128xf32>
    %593 = arith.addf %591, %592 : vector<8x128xf32>
    %594 = arith.mulf %263, %552 : vector<8x128xf32>
    %595 = arith.mulf %264, %560 : vector<8x128xf32>
    %596 = arith.addf %594, %595 : vector<8x128xf32>
    %597 = arith.mulf %265, %568 : vector<8x128xf32>
    %598 = arith.addf %596, %597 : vector<8x128xf32>
    %599 = arith.mulf %266, %548 : vector<8x128xf32>
    %600 = arith.mulf %267, %554 : vector<8x128xf32>
    %601 = arith.addf %599, %600 : vector<8x128xf32>
    %602 = arith.mulf %268, %562 : vector<8x128xf32>
    %603 = arith.addf %601, %602 : vector<8x128xf32>
    %604 = arith.mulf %266, %550 : vector<8x128xf32>
    %605 = arith.mulf %267, %558 : vector<8x128xf32>
    %606 = arith.addf %604, %605 : vector<8x128xf32>
    %607 = arith.mulf %268, %564 : vector<8x128xf32>
    %608 = arith.addf %606, %607 : vector<8x128xf32>
    %609 = arith.mulf %266, %552 : vector<8x128xf32>
    %610 = arith.mulf %267, %560 : vector<8x128xf32>
    %611 = arith.addf %609, %610 : vector<8x128xf32>
    %612 = arith.mulf %268, %568 : vector<8x128xf32>
    %613 = arith.addf %611, %612 : vector<8x128xf32>
    %cst_68 = arith.constant 0.333333343 : f32
    %614 = vector.broadcast %cst_68 : f32 to vector<8x128xf32>
    %615 = arith.mulf %573, %614 : vector<8x128xf32>
    %cst_69 = arith.constant 1.000000e+00 : f32
    %616 = vector.broadcast %cst_69 : f32 to vector<8x128xf32>
    %617 = arith.addf %615, %616 : vector<8x128xf32>
    %cst_70 = arith.constant 0.333333343 : f32
    %618 = vector.broadcast %cst_70 : f32 to vector<8x128xf32>
    %619 = arith.mulf %578, %618 : vector<8x128xf32>
    %cst_71 = arith.constant 0.333333343 : f32
    %620 = vector.broadcast %cst_71 : f32 to vector<8x128xf32>
    %621 = arith.mulf %583, %620 : vector<8x128xf32>
    %cst_72 = arith.constant 0.333333343 : f32
    %622 = vector.broadcast %cst_72 : f32 to vector<8x128xf32>
    %623 = arith.mulf %588, %622 : vector<8x128xf32>
    %cst_73 = arith.constant 0.333333343 : f32
    %624 = vector.broadcast %cst_73 : f32 to vector<8x128xf32>
    %625 = arith.mulf %593, %624 : vector<8x128xf32>
    %cst_74 = arith.constant 1.000000e+00 : f32
    %626 = vector.broadcast %cst_74 : f32 to vector<8x128xf32>
    %627 = arith.addf %625, %626 : vector<8x128xf32>
    %cst_75 = arith.constant 0.333333343 : f32
    %628 = vector.broadcast %cst_75 : f32 to vector<8x128xf32>
    %629 = arith.mulf %598, %628 : vector<8x128xf32>
    %cst_76 = arith.constant 0.333333343 : f32
    %630 = vector.broadcast %cst_76 : f32 to vector<8x128xf32>
    %631 = arith.mulf %603, %630 : vector<8x128xf32>
    %cst_77 = arith.constant 0.333333343 : f32
    %632 = vector.broadcast %cst_77 : f32 to vector<8x128xf32>
    %633 = arith.mulf %608, %632 : vector<8x128xf32>
    %cst_78 = arith.constant 0.333333343 : f32
    %634 = vector.broadcast %cst_78 : f32 to vector<8x128xf32>
    %635 = arith.mulf %613, %634 : vector<8x128xf32>
    %cst_79 = arith.constant 1.000000e+00 : f32
    %636 = vector.broadcast %cst_79 : f32 to vector<8x128xf32>
    %637 = arith.addf %635, %636 : vector<8x128xf32>
    %638 = arith.mulf %260, %617 : vector<8x128xf32>
    %639 = arith.mulf %261, %623 : vector<8x128xf32>
    %640 = arith.addf %638, %639 : vector<8x128xf32>
    %641 = arith.mulf %262, %631 : vector<8x128xf32>
    %642 = arith.addf %640, %641 : vector<8x128xf32>
    %643 = arith.mulf %260, %619 : vector<8x128xf32>
    %644 = arith.mulf %261, %627 : vector<8x128xf32>
    %645 = arith.addf %643, %644 : vector<8x128xf32>
    %646 = arith.mulf %262, %633 : vector<8x128xf32>
    %647 = arith.addf %645, %646 : vector<8x128xf32>
    %648 = arith.mulf %260, %621 : vector<8x128xf32>
    %649 = arith.mulf %261, %629 : vector<8x128xf32>
    %650 = arith.addf %648, %649 : vector<8x128xf32>
    %651 = arith.mulf %262, %637 : vector<8x128xf32>
    %652 = arith.addf %650, %651 : vector<8x128xf32>
    %653 = arith.mulf %263, %617 : vector<8x128xf32>
    %654 = arith.mulf %264, %623 : vector<8x128xf32>
    %655 = arith.addf %653, %654 : vector<8x128xf32>
    %656 = arith.mulf %265, %631 : vector<8x128xf32>
    %657 = arith.addf %655, %656 : vector<8x128xf32>
    %658 = arith.mulf %263, %619 : vector<8x128xf32>
    %659 = arith.mulf %264, %627 : vector<8x128xf32>
    %660 = arith.addf %658, %659 : vector<8x128xf32>
    %661 = arith.mulf %265, %633 : vector<8x128xf32>
    %662 = arith.addf %660, %661 : vector<8x128xf32>
    %663 = arith.mulf %263, %621 : vector<8x128xf32>
    %664 = arith.mulf %264, %629 : vector<8x128xf32>
    %665 = arith.addf %663, %664 : vector<8x128xf32>
    %666 = arith.mulf %265, %637 : vector<8x128xf32>
    %667 = arith.addf %665, %666 : vector<8x128xf32>
    %668 = arith.mulf %266, %617 : vector<8x128xf32>
    %669 = arith.mulf %267, %623 : vector<8x128xf32>
    %670 = arith.addf %668, %669 : vector<8x128xf32>
    %671 = arith.mulf %268, %631 : vector<8x128xf32>
    %672 = arith.addf %670, %671 : vector<8x128xf32>
    %673 = arith.mulf %266, %619 : vector<8x128xf32>
    %674 = arith.mulf %267, %627 : vector<8x128xf32>
    %675 = arith.addf %673, %674 : vector<8x128xf32>
    %676 = arith.mulf %268, %633 : vector<8x128xf32>
    %677 = arith.addf %675, %676 : vector<8x128xf32>
    %678 = arith.mulf %266, %621 : vector<8x128xf32>
    %679 = arith.mulf %267, %629 : vector<8x128xf32>
    %680 = arith.addf %678, %679 : vector<8x128xf32>
    %681 = arith.mulf %268, %637 : vector<8x128xf32>
    %682 = arith.addf %680, %681 : vector<8x128xf32>
    %cst_80 = arith.constant 5.000000e-01 : f32
    %683 = vector.broadcast %cst_80 : f32 to vector<8x128xf32>
    %684 = arith.mulf %642, %683 : vector<8x128xf32>
    %cst_81 = arith.constant 1.000000e+00 : f32
    %685 = vector.broadcast %cst_81 : f32 to vector<8x128xf32>
    %686 = arith.addf %684, %685 : vector<8x128xf32>
    %cst_82 = arith.constant 5.000000e-01 : f32
    %687 = vector.broadcast %cst_82 : f32 to vector<8x128xf32>
    %688 = arith.mulf %647, %687 : vector<8x128xf32>
    %cst_83 = arith.constant 5.000000e-01 : f32
    %689 = vector.broadcast %cst_83 : f32 to vector<8x128xf32>
    %690 = arith.mulf %652, %689 : vector<8x128xf32>
    %cst_84 = arith.constant 5.000000e-01 : f32
    %691 = vector.broadcast %cst_84 : f32 to vector<8x128xf32>
    %692 = arith.mulf %657, %691 : vector<8x128xf32>
    %cst_85 = arith.constant 5.000000e-01 : f32
    %693 = vector.broadcast %cst_85 : f32 to vector<8x128xf32>
    %694 = arith.mulf %662, %693 : vector<8x128xf32>
    %cst_86 = arith.constant 1.000000e+00 : f32
    %695 = vector.broadcast %cst_86 : f32 to vector<8x128xf32>
    %696 = arith.addf %694, %695 : vector<8x128xf32>
    %cst_87 = arith.constant 5.000000e-01 : f32
    %697 = vector.broadcast %cst_87 : f32 to vector<8x128xf32>
    %698 = arith.mulf %667, %697 : vector<8x128xf32>
    %cst_88 = arith.constant 5.000000e-01 : f32
    %699 = vector.broadcast %cst_88 : f32 to vector<8x128xf32>
    %700 = arith.mulf %672, %699 : vector<8x128xf32>
    %cst_89 = arith.constant 5.000000e-01 : f32
    %701 = vector.broadcast %cst_89 : f32 to vector<8x128xf32>
    %702 = arith.mulf %677, %701 : vector<8x128xf32>
    %cst_90 = arith.constant 5.000000e-01 : f32
    %703 = vector.broadcast %cst_90 : f32 to vector<8x128xf32>
    %704 = arith.mulf %682, %703 : vector<8x128xf32>
    %cst_91 = arith.constant 1.000000e+00 : f32
    %705 = vector.broadcast %cst_91 : f32 to vector<8x128xf32>
    %706 = arith.addf %704, %705 : vector<8x128xf32>
    %707 = arith.mulf %260, %686 : vector<8x128xf32>
    %708 = arith.mulf %261, %692 : vector<8x128xf32>
    %709 = arith.addf %707, %708 : vector<8x128xf32>
    %710 = arith.mulf %262, %700 : vector<8x128xf32>
    %711 = arith.addf %709, %710 : vector<8x128xf32>
    %712 = arith.mulf %260, %688 : vector<8x128xf32>
    %713 = arith.mulf %261, %696 : vector<8x128xf32>
    %714 = arith.addf %712, %713 : vector<8x128xf32>
    %715 = arith.mulf %262, %702 : vector<8x128xf32>
    %716 = arith.addf %714, %715 : vector<8x128xf32>
    %717 = arith.mulf %260, %690 : vector<8x128xf32>
    %718 = arith.mulf %261, %698 : vector<8x128xf32>
    %719 = arith.addf %717, %718 : vector<8x128xf32>
    %720 = arith.mulf %262, %706 : vector<8x128xf32>
    %721 = arith.addf %719, %720 : vector<8x128xf32>
    %722 = arith.mulf %263, %686 : vector<8x128xf32>
    %723 = arith.mulf %264, %692 : vector<8x128xf32>
    %724 = arith.addf %722, %723 : vector<8x128xf32>
    %725 = arith.mulf %265, %700 : vector<8x128xf32>
    %726 = arith.addf %724, %725 : vector<8x128xf32>
    %727 = arith.mulf %263, %688 : vector<8x128xf32>
    %728 = arith.mulf %264, %696 : vector<8x128xf32>
    %729 = arith.addf %727, %728 : vector<8x128xf32>
    %730 = arith.mulf %265, %702 : vector<8x128xf32>
    %731 = arith.addf %729, %730 : vector<8x128xf32>
    %732 = arith.mulf %263, %690 : vector<8x128xf32>
    %733 = arith.mulf %264, %698 : vector<8x128xf32>
    %734 = arith.addf %732, %733 : vector<8x128xf32>
    %735 = arith.mulf %265, %706 : vector<8x128xf32>
    %736 = arith.addf %734, %735 : vector<8x128xf32>
    %737 = arith.mulf %266, %686 : vector<8x128xf32>
    %738 = arith.mulf %267, %692 : vector<8x128xf32>
    %739 = arith.addf %737, %738 : vector<8x128xf32>
    %740 = arith.mulf %268, %700 : vector<8x128xf32>
    %741 = arith.addf %739, %740 : vector<8x128xf32>
    %742 = arith.mulf %266, %688 : vector<8x128xf32>
    %743 = arith.mulf %267, %696 : vector<8x128xf32>
    %744 = arith.addf %742, %743 : vector<8x128xf32>
    %745 = arith.mulf %268, %702 : vector<8x128xf32>
    %746 = arith.addf %744, %745 : vector<8x128xf32>
    %747 = arith.mulf %266, %690 : vector<8x128xf32>
    %748 = arith.mulf %267, %698 : vector<8x128xf32>
    %749 = arith.addf %747, %748 : vector<8x128xf32>
    %750 = arith.mulf %268, %706 : vector<8x128xf32>
    %751 = arith.addf %749, %750 : vector<8x128xf32>
    %cst_92 = arith.constant 1.000000e+00 : f32
    %752 = vector.broadcast %cst_92 : f32 to vector<8x128xf32>
    %753 = arith.mulf %711, %752 : vector<8x128xf32>
    %cst_93 = arith.constant 1.000000e+00 : f32
    %754 = vector.broadcast %cst_93 : f32 to vector<8x128xf32>
    %755 = arith.addf %753, %754 : vector<8x128xf32>
    %cst_94 = arith.constant 1.000000e+00 : f32
    %756 = vector.broadcast %cst_94 : f32 to vector<8x128xf32>
    %757 = arith.mulf %716, %756 : vector<8x128xf32>
    %cst_95 = arith.constant 1.000000e+00 : f32
    %758 = vector.broadcast %cst_95 : f32 to vector<8x128xf32>
    %759 = arith.mulf %721, %758 : vector<8x128xf32>
    %cst_96 = arith.constant 1.000000e+00 : f32
    %760 = vector.broadcast %cst_96 : f32 to vector<8x128xf32>
    %761 = arith.mulf %726, %760 : vector<8x128xf32>
    %cst_97 = arith.constant 1.000000e+00 : f32
    %762 = vector.broadcast %cst_97 : f32 to vector<8x128xf32>
    %763 = arith.mulf %731, %762 : vector<8x128xf32>
    %cst_98 = arith.constant 1.000000e+00 : f32
    %764 = vector.broadcast %cst_98 : f32 to vector<8x128xf32>
    %765 = arith.addf %763, %764 : vector<8x128xf32>
    %cst_99 = arith.constant 1.000000e+00 : f32
    %766 = vector.broadcast %cst_99 : f32 to vector<8x128xf32>
    %767 = arith.mulf %736, %766 : vector<8x128xf32>
    %cst_100 = arith.constant 1.000000e+00 : f32
    %768 = vector.broadcast %cst_100 : f32 to vector<8x128xf32>
    %769 = arith.mulf %741, %768 : vector<8x128xf32>
    %cst_101 = arith.constant 1.000000e+00 : f32
    %770 = vector.broadcast %cst_101 : f32 to vector<8x128xf32>
    %771 = arith.mulf %746, %770 : vector<8x128xf32>
    %cst_102 = arith.constant 1.000000e+00 : f32
    %772 = vector.broadcast %cst_102 : f32 to vector<8x128xf32>
    %773 = arith.mulf %751, %772 : vector<8x128xf32>
    %cst_103 = arith.constant 1.000000e+00 : f32
    %774 = vector.broadcast %cst_103 : f32 to vector<8x128xf32>
    %775 = arith.addf %773, %774 : vector<8x128xf32>
    %776 = arith.mulf %755, %755 : vector<8x128xf32>
    %777 = arith.mulf %757, %761 : vector<8x128xf32>
    %778 = arith.addf %776, %777 : vector<8x128xf32>
    %779 = arith.mulf %759, %769 : vector<8x128xf32>
    %780 = arith.addf %778, %779 : vector<8x128xf32>
    %781 = arith.mulf %755, %757 : vector<8x128xf32>
    %782 = arith.mulf %757, %765 : vector<8x128xf32>
    %783 = arith.addf %781, %782 : vector<8x128xf32>
    %784 = arith.mulf %759, %771 : vector<8x128xf32>
    %785 = arith.addf %783, %784 : vector<8x128xf32>
    %786 = arith.mulf %755, %759 : vector<8x128xf32>
    %787 = arith.mulf %757, %767 : vector<8x128xf32>
    %788 = arith.addf %786, %787 : vector<8x128xf32>
    %789 = arith.mulf %759, %775 : vector<8x128xf32>
    %790 = arith.addf %788, %789 : vector<8x128xf32>
    %791 = arith.mulf %761, %755 : vector<8x128xf32>
    %792 = arith.mulf %765, %761 : vector<8x128xf32>
    %793 = arith.addf %791, %792 : vector<8x128xf32>
    %794 = arith.mulf %767, %769 : vector<8x128xf32>
    %795 = arith.addf %793, %794 : vector<8x128xf32>
    %796 = arith.mulf %761, %757 : vector<8x128xf32>
    %797 = arith.mulf %765, %765 : vector<8x128xf32>
    %798 = arith.addf %796, %797 : vector<8x128xf32>
    %799 = arith.mulf %767, %771 : vector<8x128xf32>
    %800 = arith.addf %798, %799 : vector<8x128xf32>
    %801 = arith.mulf %761, %759 : vector<8x128xf32>
    %802 = arith.mulf %765, %767 : vector<8x128xf32>
    %803 = arith.addf %801, %802 : vector<8x128xf32>
    %804 = arith.mulf %767, %775 : vector<8x128xf32>
    %805 = arith.addf %803, %804 : vector<8x128xf32>
    %806 = arith.mulf %769, %755 : vector<8x128xf32>
    %807 = arith.mulf %771, %761 : vector<8x128xf32>
    %808 = arith.addf %806, %807 : vector<8x128xf32>
    %809 = arith.mulf %775, %769 : vector<8x128xf32>
    %810 = arith.addf %808, %809 : vector<8x128xf32>
    %811 = arith.mulf %769, %757 : vector<8x128xf32>
    %812 = arith.mulf %771, %765 : vector<8x128xf32>
    %813 = arith.addf %811, %812 : vector<8x128xf32>
    %814 = arith.mulf %775, %771 : vector<8x128xf32>
    %815 = arith.addf %813, %814 : vector<8x128xf32>
    %816 = arith.mulf %769, %759 : vector<8x128xf32>
    %817 = arith.mulf %771, %767 : vector<8x128xf32>
    %818 = arith.addf %816, %817 : vector<8x128xf32>
    %819 = arith.mulf %775, %775 : vector<8x128xf32>
    %820 = arith.addf %818, %819 : vector<8x128xf32>
    %c0_i32_104 = arith.constant 0 : i32
    %821 = vector.broadcast %c0_i32_104 : i32 to vector<8x128xi32>
    %822 = arith.cmpi sgt, %254, %821 : vector<8x128xi32>
    %823 = arith.select %822, %780, %755 : vector<8x128xi1>, vector<8x128xf32>
    %824 = arith.select %822, %785, %757 : vector<8x128xi1>, vector<8x128xf32>
    %825 = arith.select %822, %790, %759 : vector<8x128xi1>, vector<8x128xf32>
    %826 = arith.select %822, %795, %761 : vector<8x128xi1>, vector<8x128xf32>
    %827 = arith.select %822, %800, %765 : vector<8x128xi1>, vector<8x128xf32>
    %828 = arith.select %822, %805, %767 : vector<8x128xi1>, vector<8x128xf32>
    %829 = arith.select %822, %810, %769 : vector<8x128xi1>, vector<8x128xf32>
    %830 = arith.select %822, %815, %771 : vector<8x128xi1>, vector<8x128xf32>
    %831 = arith.select %822, %820, %775 : vector<8x128xi1>, vector<8x128xf32>
    %832 = arith.mulf %823, %823 : vector<8x128xf32>
    %833 = arith.mulf %824, %826 : vector<8x128xf32>
    %834 = arith.addf %832, %833 : vector<8x128xf32>
    %835 = arith.mulf %825, %829 : vector<8x128xf32>
    %836 = arith.addf %834, %835 : vector<8x128xf32>
    %837 = arith.mulf %823, %824 : vector<8x128xf32>
    %838 = arith.mulf %824, %827 : vector<8x128xf32>
    %839 = arith.addf %837, %838 : vector<8x128xf32>
    %840 = arith.mulf %825, %830 : vector<8x128xf32>
    %841 = arith.addf %839, %840 : vector<8x128xf32>
    %842 = arith.mulf %823, %825 : vector<8x128xf32>
    %843 = arith.mulf %824, %828 : vector<8x128xf32>
    %844 = arith.addf %842, %843 : vector<8x128xf32>
    %845 = arith.mulf %825, %831 : vector<8x128xf32>
    %846 = arith.addf %844, %845 : vector<8x128xf32>
    %847 = arith.mulf %826, %823 : vector<8x128xf32>
    %848 = arith.mulf %827, %826 : vector<8x128xf32>
    %849 = arith.addf %847, %848 : vector<8x128xf32>
    %850 = arith.mulf %828, %829 : vector<8x128xf32>
    %851 = arith.addf %849, %850 : vector<8x128xf32>
    %852 = arith.mulf %826, %824 : vector<8x128xf32>
    %853 = arith.mulf %827, %827 : vector<8x128xf32>
    %854 = arith.addf %852, %853 : vector<8x128xf32>
    %855 = arith.mulf %828, %830 : vector<8x128xf32>
    %856 = arith.addf %854, %855 : vector<8x128xf32>
    %857 = arith.mulf %826, %825 : vector<8x128xf32>
    %858 = arith.mulf %827, %828 : vector<8x128xf32>
    %859 = arith.addf %857, %858 : vector<8x128xf32>
    %860 = arith.mulf %828, %831 : vector<8x128xf32>
    %861 = arith.addf %859, %860 : vector<8x128xf32>
    %862 = arith.mulf %829, %823 : vector<8x128xf32>
    %863 = arith.mulf %830, %826 : vector<8x128xf32>
    %864 = arith.addf %862, %863 : vector<8x128xf32>
    %865 = arith.mulf %831, %829 : vector<8x128xf32>
    %866 = arith.addf %864, %865 : vector<8x128xf32>
    %867 = arith.mulf %829, %824 : vector<8x128xf32>
    %868 = arith.mulf %830, %827 : vector<8x128xf32>
    %869 = arith.addf %867, %868 : vector<8x128xf32>
    %870 = arith.mulf %831, %830 : vector<8x128xf32>
    %871 = arith.addf %869, %870 : vector<8x128xf32>
    %872 = arith.mulf %829, %825 : vector<8x128xf32>
    %873 = arith.mulf %830, %828 : vector<8x128xf32>
    %874 = arith.addf %872, %873 : vector<8x128xf32>
    %875 = arith.mulf %831, %831 : vector<8x128xf32>
    %876 = arith.addf %874, %875 : vector<8x128xf32>
    %c1_i32_105 = arith.constant 1 : i32
    %877 = vector.broadcast %c1_i32_105 : i32 to vector<8x128xi32>
    %878 = arith.cmpi sgt, %254, %877 : vector<8x128xi32>
    %879 = arith.select %878, %836, %823 : vector<8x128xi1>, vector<8x128xf32>
    %880 = arith.select %878, %841, %824 : vector<8x128xi1>, vector<8x128xf32>
    %881 = arith.select %878, %846, %825 : vector<8x128xi1>, vector<8x128xf32>
    %882 = arith.select %878, %851, %826 : vector<8x128xi1>, vector<8x128xf32>
    %883 = arith.select %878, %856, %827 : vector<8x128xi1>, vector<8x128xf32>
    %884 = arith.select %878, %861, %828 : vector<8x128xi1>, vector<8x128xf32>
    %885 = arith.select %878, %866, %829 : vector<8x128xi1>, vector<8x128xf32>
    %886 = arith.select %878, %871, %830 : vector<8x128xi1>, vector<8x128xf32>
    %887 = arith.select %878, %876, %831 : vector<8x128xi1>, vector<8x128xf32>
    %888 = arith.mulf %879, %879 : vector<8x128xf32>
    %889 = arith.mulf %880, %882 : vector<8x128xf32>
    %890 = arith.addf %888, %889 : vector<8x128xf32>
    %891 = arith.mulf %881, %885 : vector<8x128xf32>
    %892 = arith.addf %890, %891 : vector<8x128xf32>
    %893 = arith.mulf %879, %880 : vector<8x128xf32>
    %894 = arith.mulf %880, %883 : vector<8x128xf32>
    %895 = arith.addf %893, %894 : vector<8x128xf32>
    %896 = arith.mulf %881, %886 : vector<8x128xf32>
    %897 = arith.addf %895, %896 : vector<8x128xf32>
    %898 = arith.mulf %879, %881 : vector<8x128xf32>
    %899 = arith.mulf %880, %884 : vector<8x128xf32>
    %900 = arith.addf %898, %899 : vector<8x128xf32>
    %901 = arith.mulf %881, %887 : vector<8x128xf32>
    %902 = arith.addf %900, %901 : vector<8x128xf32>
    %903 = arith.mulf %882, %879 : vector<8x128xf32>
    %904 = arith.mulf %883, %882 : vector<8x128xf32>
    %905 = arith.addf %903, %904 : vector<8x128xf32>
    %906 = arith.mulf %884, %885 : vector<8x128xf32>
    %907 = arith.addf %905, %906 : vector<8x128xf32>
    %908 = arith.mulf %882, %880 : vector<8x128xf32>
    %909 = arith.mulf %883, %883 : vector<8x128xf32>
    %910 = arith.addf %908, %909 : vector<8x128xf32>
    %911 = arith.mulf %884, %886 : vector<8x128xf32>
    %912 = arith.addf %910, %911 : vector<8x128xf32>
    %913 = arith.mulf %882, %881 : vector<8x128xf32>
    %914 = arith.mulf %883, %884 : vector<8x128xf32>
    %915 = arith.addf %913, %914 : vector<8x128xf32>
    %916 = arith.mulf %884, %887 : vector<8x128xf32>
    %917 = arith.addf %915, %916 : vector<8x128xf32>
    %918 = arith.mulf %885, %879 : vector<8x128xf32>
    %919 = arith.mulf %886, %882 : vector<8x128xf32>
    %920 = arith.addf %918, %919 : vector<8x128xf32>
    %921 = arith.mulf %887, %885 : vector<8x128xf32>
    %922 = arith.addf %920, %921 : vector<8x128xf32>
    %923 = arith.mulf %885, %880 : vector<8x128xf32>
    %924 = arith.mulf %886, %883 : vector<8x128xf32>
    %925 = arith.addf %923, %924 : vector<8x128xf32>
    %926 = arith.mulf %887, %886 : vector<8x128xf32>
    %927 = arith.addf %925, %926 : vector<8x128xf32>
    %928 = arith.mulf %885, %881 : vector<8x128xf32>
    %929 = arith.mulf %886, %884 : vector<8x128xf32>
    %930 = arith.addf %928, %929 : vector<8x128xf32>
    %931 = arith.mulf %887, %887 : vector<8x128xf32>
    %932 = arith.addf %930, %931 : vector<8x128xf32>
    %c2_i32 = arith.constant 2 : i32
    %933 = vector.broadcast %c2_i32 : i32 to vector<8x128xi32>
    %934 = arith.cmpi sgt, %254, %933 : vector<8x128xi32>
    %935 = arith.select %934, %892, %879 : vector<8x128xi1>, vector<8x128xf32>
    %936 = arith.select %934, %897, %880 : vector<8x128xi1>, vector<8x128xf32>
    %937 = arith.select %934, %902, %881 : vector<8x128xi1>, vector<8x128xf32>
    %938 = arith.select %934, %907, %882 : vector<8x128xi1>, vector<8x128xf32>
    %939 = arith.select %934, %912, %883 : vector<8x128xi1>, vector<8x128xf32>
    %940 = arith.select %934, %917, %884 : vector<8x128xi1>, vector<8x128xf32>
    %941 = arith.select %934, %922, %885 : vector<8x128xi1>, vector<8x128xf32>
    %942 = arith.select %934, %927, %886 : vector<8x128xi1>, vector<8x128xf32>
    %943 = arith.select %934, %932, %887 : vector<8x128xi1>, vector<8x128xf32>
    %944 = arith.mulf %935, %935 : vector<8x128xf32>
    %945 = arith.mulf %936, %938 : vector<8x128xf32>
    %946 = arith.addf %944, %945 : vector<8x128xf32>
    %947 = arith.mulf %937, %941 : vector<8x128xf32>
    %948 = arith.addf %946, %947 : vector<8x128xf32>
    %949 = arith.mulf %935, %936 : vector<8x128xf32>
    %950 = arith.mulf %936, %939 : vector<8x128xf32>
    %951 = arith.addf %949, %950 : vector<8x128xf32>
    %952 = arith.mulf %937, %942 : vector<8x128xf32>
    %953 = arith.addf %951, %952 : vector<8x128xf32>
    %954 = arith.mulf %935, %937 : vector<8x128xf32>
    %955 = arith.mulf %936, %940 : vector<8x128xf32>
    %956 = arith.addf %954, %955 : vector<8x128xf32>
    %957 = arith.mulf %937, %943 : vector<8x128xf32>
    %958 = arith.addf %956, %957 : vector<8x128xf32>
    %959 = arith.mulf %938, %935 : vector<8x128xf32>
    %960 = arith.mulf %939, %938 : vector<8x128xf32>
    %961 = arith.addf %959, %960 : vector<8x128xf32>
    %962 = arith.mulf %940, %941 : vector<8x128xf32>
    %963 = arith.addf %961, %962 : vector<8x128xf32>
    %964 = arith.mulf %938, %936 : vector<8x128xf32>
    %965 = arith.mulf %939, %939 : vector<8x128xf32>
    %966 = arith.addf %964, %965 : vector<8x128xf32>
    %967 = arith.mulf %940, %942 : vector<8x128xf32>
    %968 = arith.addf %966, %967 : vector<8x128xf32>
    %969 = arith.mulf %938, %937 : vector<8x128xf32>
    %970 = arith.mulf %939, %940 : vector<8x128xf32>
    %971 = arith.addf %969, %970 : vector<8x128xf32>
    %972 = arith.mulf %940, %943 : vector<8x128xf32>
    %973 = arith.addf %971, %972 : vector<8x128xf32>
    %974 = arith.mulf %941, %935 : vector<8x128xf32>
    %975 = arith.mulf %942, %938 : vector<8x128xf32>
    %976 = arith.addf %974, %975 : vector<8x128xf32>
    %977 = arith.mulf %943, %941 : vector<8x128xf32>
    %978 = arith.addf %976, %977 : vector<8x128xf32>
    %979 = arith.mulf %941, %936 : vector<8x128xf32>
    %980 = arith.mulf %942, %939 : vector<8x128xf32>
    %981 = arith.addf %979, %980 : vector<8x128xf32>
    %982 = arith.mulf %943, %942 : vector<8x128xf32>
    %983 = arith.addf %981, %982 : vector<8x128xf32>
    %984 = arith.mulf %941, %937 : vector<8x128xf32>
    %985 = arith.mulf %942, %940 : vector<8x128xf32>
    %986 = arith.addf %984, %985 : vector<8x128xf32>
    %987 = arith.mulf %943, %943 : vector<8x128xf32>
    %988 = arith.addf %986, %987 : vector<8x128xf32>
    %c3_i32 = arith.constant 3 : i32
    %989 = vector.broadcast %c3_i32 : i32 to vector<8x128xi32>
    %990 = arith.cmpi sgt, %254, %989 : vector<8x128xi32>
    %991 = arith.select %990, %948, %935 : vector<8x128xi1>, vector<8x128xf32>
    %992 = arith.select %990, %953, %936 : vector<8x128xi1>, vector<8x128xf32>
    %993 = arith.select %990, %958, %937 : vector<8x128xi1>, vector<8x128xf32>
    %994 = arith.select %990, %963, %938 : vector<8x128xi1>, vector<8x128xf32>
    %995 = arith.select %990, %968, %939 : vector<8x128xi1>, vector<8x128xf32>
    %996 = arith.select %990, %973, %940 : vector<8x128xi1>, vector<8x128xf32>
    %997 = arith.select %990, %978, %941 : vector<8x128xi1>, vector<8x128xf32>
    %998 = arith.select %990, %983, %942 : vector<8x128xi1>, vector<8x128xf32>
    %999 = arith.select %990, %988, %943 : vector<8x128xi1>, vector<8x128xf32>
    %1000 = vector.shape_cast %254 : vector<8x128xi32> to vector<1x8x128xi32>
    %cst_106 = arith.constant dense<-2147483648> : vector<1xi32>
    %1001 = vector.multi_reduction <maxsi>, %1000, %cst_106 [1, 2] : vector<1x8x128xi32> to vector<1xi32>
    %1002 = vector.shape_cast %1001 : vector<1xi32> to vector<1x1x1xi32>
    %1003 = vector.extract %1002[0, 0, 0] : i32 from vector<1x1x1xi32>
    %c4_i32 = arith.constant 4 : i32
    %1004 = arith.subi %1003, %c4_i32 : i32
    %1005 = arith.addi %c4_i32, %1004 : i32
    %c1_i32_107 = arith.constant 1 : i32
    %1006:9 = scf.for %arg5 = %c4_i32 to %1005 step %c1_i32_107 iter_args(%arg6 = %991, %arg7 = %992, %arg8 = %993, %arg9 = %994, %arg10 = %995, %arg11 = %996, %arg12 = %997, %arg13 = %998, %arg14 = %999) -> (vector<8x128xf32>, vector<8x128xf32>, vector<8x128xf32>, vector<8x128xf32>, vector<8x128xf32>, vector<8x128xf32>, vector<8x128xf32>, vector<8x128xf32>, vector<8x128xf32>)  : i32 {
      %1052 = arith.mulf %arg6, %arg6 : vector<8x128xf32>
      %1053 = arith.mulf %arg7, %arg9 : vector<8x128xf32>
      %1054 = arith.addf %1052, %1053 : vector<8x128xf32>
      %1055 = arith.mulf %arg8, %arg12 : vector<8x128xf32>
      %1056 = arith.addf %1054, %1055 : vector<8x128xf32>
      %1057 = arith.mulf %arg6, %arg7 : vector<8x128xf32>
      %1058 = arith.mulf %arg7, %arg10 : vector<8x128xf32>
      %1059 = arith.addf %1057, %1058 : vector<8x128xf32>
      %1060 = arith.mulf %arg8, %arg13 : vector<8x128xf32>
      %1061 = arith.addf %1059, %1060 : vector<8x128xf32>
      %1062 = arith.mulf %arg6, %arg8 : vector<8x128xf32>
      %1063 = arith.mulf %arg7, %arg11 : vector<8x128xf32>
      %1064 = arith.addf %1062, %1063 : vector<8x128xf32>
      %1065 = arith.mulf %arg8, %arg14 : vector<8x128xf32>
      %1066 = arith.addf %1064, %1065 : vector<8x128xf32>
      %1067 = arith.mulf %arg9, %arg6 : vector<8x128xf32>
      %1068 = arith.mulf %arg10, %arg9 : vector<8x128xf32>
      %1069 = arith.addf %1067, %1068 : vector<8x128xf32>
      %1070 = arith.mulf %arg11, %arg12 : vector<8x128xf32>
      %1071 = arith.addf %1069, %1070 : vector<8x128xf32>
      %1072 = arith.mulf %arg9, %arg7 : vector<8x128xf32>
      %1073 = arith.mulf %arg10, %arg10 : vector<8x128xf32>
      %1074 = arith.addf %1072, %1073 : vector<8x128xf32>
      %1075 = arith.mulf %arg11, %arg13 : vector<8x128xf32>
      %1076 = arith.addf %1074, %1075 : vector<8x128xf32>
      %1077 = arith.mulf %arg9, %arg8 : vector<8x128xf32>
      %1078 = arith.mulf %arg10, %arg11 : vector<8x128xf32>
      %1079 = arith.addf %1077, %1078 : vector<8x128xf32>
      %1080 = arith.mulf %arg11, %arg14 : vector<8x128xf32>
      %1081 = arith.addf %1079, %1080 : vector<8x128xf32>
      %1082 = arith.mulf %arg12, %arg6 : vector<8x128xf32>
      %1083 = arith.mulf %arg13, %arg9 : vector<8x128xf32>
      %1084 = arith.addf %1082, %1083 : vector<8x128xf32>
      %1085 = arith.mulf %arg14, %arg12 : vector<8x128xf32>
      %1086 = arith.addf %1084, %1085 : vector<8x128xf32>
      %1087 = arith.mulf %arg12, %arg7 : vector<8x128xf32>
      %1088 = arith.mulf %arg13, %arg10 : vector<8x128xf32>
      %1089 = arith.addf %1087, %1088 : vector<8x128xf32>
      %1090 = arith.mulf %arg14, %arg13 : vector<8x128xf32>
      %1091 = arith.addf %1089, %1090 : vector<8x128xf32>
      %1092 = arith.mulf %arg12, %arg8 : vector<8x128xf32>
      %1093 = arith.mulf %arg13, %arg11 : vector<8x128xf32>
      %1094 = arith.addf %1092, %1093 : vector<8x128xf32>
      %1095 = arith.mulf %arg14, %arg14 : vector<8x128xf32>
      %1096 = arith.addf %1094, %1095 : vector<8x128xf32>
      %1097 = vector.broadcast %arg5 : i32 to vector<8x128xi32>
      %1098 = arith.cmpi slt, %1097, %254 : vector<8x128xi32>
      %1099 = arith.select %1098, %1056, %arg6 : vector<8x128xi1>, vector<8x128xf32>
      %1100 = arith.select %1098, %1061, %arg7 : vector<8x128xi1>, vector<8x128xf32>
      %1101 = arith.select %1098, %1066, %arg8 : vector<8x128xi1>, vector<8x128xf32>
      %1102 = arith.select %1098, %1071, %arg9 : vector<8x128xi1>, vector<8x128xf32>
      %1103 = arith.select %1098, %1076, %arg10 : vector<8x128xi1>, vector<8x128xf32>
      %1104 = arith.select %1098, %1081, %arg11 : vector<8x128xi1>, vector<8x128xf32>
      %1105 = arith.select %1098, %1086, %arg12 : vector<8x128xi1>, vector<8x128xf32>
      %1106 = arith.select %1098, %1091, %arg13 : vector<8x128xi1>, vector<8x128xf32>
      %1107 = arith.select %1098, %1096, %arg14 : vector<8x128xi1>, vector<8x128xf32>
      scf.yield %1099, %1100, %1101, %1102, %1103, %1104, %1105, %1106, %1107 : vector<8x128xf32>, vector<8x128xf32>, vector<8x128xf32>, vector<8x128xf32>, vector<8x128xf32>, vector<8x128xf32>, vector<8x128xf32>, vector<8x128xf32>, vector<8x128xf32>
    }
    %1007 = vector.extract_strided_slice %7 {offsets = [0, 0, 0], sizes = [1, 8, 128], strides = [1, 1, 1]} : vector<3x8x128xf32> to vector<1x8x128xf32>
    %1008 = vector.shape_cast %1007 : vector<1x8x128xf32> to vector<8x128xf32>
    %1009 = arith.mulf %1006#0, %1008 : vector<8x128xf32>
    %1010 = vector.extract_strided_slice %7 {offsets = [1, 0, 0], sizes = [1, 8, 128], strides = [1, 1, 1]} : vector<3x8x128xf32> to vector<1x8x128xf32>
    %1011 = vector.shape_cast %1010 : vector<1x8x128xf32> to vector<8x128xf32>
    %1012 = arith.mulf %1006#1, %1011 : vector<8x128xf32>
    %1013 = arith.addf %1009, %1012 : vector<8x128xf32>
    %1014 = vector.extract_strided_slice %7 {offsets = [2, 0, 0], sizes = [1, 8, 128], strides = [1, 1, 1]} : vector<3x8x128xf32> to vector<1x8x128xf32>
    %1015 = vector.shape_cast %1014 : vector<1x8x128xf32> to vector<8x128xf32>
    %1016 = arith.mulf %1006#2, %1015 : vector<8x128xf32>
    %1017 = arith.addf %1013, %1016 : vector<8x128xf32>
    %1018 = arith.index_cast %1 : i32 to index
    %c0_108 = arith.constant 0 : index
    %c0_109 = arith.constant 0 : index
    %c0_110 = arith.constant 0 : index
    %1019 = vector.load %arg4[%1018, %c0_108, %c0_109, %c0_110] : memref<1x3x8x128xf32, #tpu.memory_space<vmem>>, vector<1x1x8x128xf32>
    %1020 = vector.shape_cast %1019 : vector<1x1x8x128xf32> to vector<8x128xf32>
    %1021 = vector.shape_cast %1017 : vector<8x128xf32> to vector<1x1x8x128xf32>
    tpu.vector_store %arg4[%1018, %c0_108, %c0_109, %c0_110], %1021 {strides = array<i32>} : memref<1x3x8x128xf32, #tpu.memory_space<vmem>>, vector<1x1x8x128xf32>,
    %1022 = vector.extract_strided_slice %7 {offsets = [0, 0, 0], sizes = [1, 8, 128], strides = [1, 1, 1]} : vector<3x8x128xf32> to vector<1x8x128xf32>
    %1023 = vector.shape_cast %1022 : vector<1x8x128xf32> to vector<8x128xf32>
    %1024 = arith.mulf %1006#3, %1023 : vector<8x128xf32>
    %1025 = vector.extract_strided_slice %7 {offsets = [1, 0, 0], sizes = [1, 8, 128], strides = [1, 1, 1]} : vector<3x8x128xf32> to vector<1x8x128xf32>
    %1026 = vector.shape_cast %1025 : vector<1x8x128xf32> to vector<8x128xf32>
    %1027 = arith.mulf %1006#4, %1026 : vector<8x128xf32>
    %1028 = arith.addf %1024, %1027 : vector<8x128xf32>
    %1029 = vector.extract_strided_slice %7 {offsets = [2, 0, 0], sizes = [1, 8, 128], strides = [1, 1, 1]} : vector<3x8x128xf32> to vector<1x8x128xf32>
    %1030 = vector.shape_cast %1029 : vector<1x8x128xf32> to vector<8x128xf32>
    %1031 = arith.mulf %1006#5, %1030 : vector<8x128xf32>
    %1032 = arith.addf %1028, %1031 : vector<8x128xf32>
    %1033 = arith.index_cast %1 : i32 to index
    %c1_111 = arith.constant 1 : index
    %c0_112 = arith.constant 0 : index
    %c0_113 = arith.constant 0 : index
    %1034 = vector.load %arg4[%1033, %c1_111, %c0_112, %c0_113] : memref<1x3x8x128xf32, #tpu.memory_space<vmem>>, vector<1x1x8x128xf32>
    %1035 = vector.shape_cast %1034 : vector<1x1x8x128xf32> to vector<8x128xf32>
    %1036 = vector.shape_cast %1032 : vector<8x128xf32> to vector<1x1x8x128xf32>
    tpu.vector_store %arg4[%1033, %c1_111, %c0_112, %c0_113], %1036 {strides = array<i32>} : memref<1x3x8x128xf32, #tpu.memory_space<vmem>>, vector<1x1x8x128xf32>,
    %1037 = vector.extract_strided_slice %7 {offsets = [0, 0, 0], sizes = [1, 8, 128], strides = [1, 1, 1]} : vector<3x8x128xf32> to vector<1x8x128xf32>
    %1038 = vector.shape_cast %1037 : vector<1x8x128xf32> to vector<8x128xf32>
    %1039 = arith.mulf %1006#6, %1038 : vector<8x128xf32>
    %1040 = vector.extract_strided_slice %7 {offsets = [1, 0, 0], sizes = [1, 8, 128], strides = [1, 1, 1]} : vector<3x8x128xf32> to vector<1x8x128xf32>
    %1041 = vector.shape_cast %1040 : vector<1x8x128xf32> to vector<8x128xf32>
    %1042 = arith.mulf %1006#7, %1041 : vector<8x128xf32>
    %1043 = arith.addf %1039, %1042 : vector<8x128xf32>
    %1044 = vector.extract_strided_slice %7 {offsets = [2, 0, 0], sizes = [1, 8, 128], strides = [1, 1, 1]} : vector<3x8x128xf32> to vector<1x8x128xf32>
    %1045 = vector.shape_cast %1044 : vector<1x8x128xf32> to vector<8x128xf32>
    %1046 = arith.mulf %1006#8, %1045 : vector<8x128xf32>
    %1047 = arith.addf %1043, %1046 : vector<8x128xf32>
    %1048 = arith.index_cast %1 : i32 to index
    %c2_114 = arith.constant 2 : index
    %c0_115 = arith.constant 0 : index
    %c0_116 = arith.constant 0 : index
    %1049 = vector.load %arg4[%1048, %c2_114, %c0_115, %c0_116] : memref<1x3x8x128xf32, #tpu.memory_space<vmem>>, vector<1x1x8x128xf32>
    %1050 = vector.shape_cast %1049 : vector<1x1x8x128xf32> to vector<8x128xf32>
    %1051 = vector.shape_cast %1047 : vector<8x128xf32> to vector<1x1x8x128xf32>
    tpu.vector_store %arg4[%1048, %c2_114, %c0_115, %c0_116], %1051 {strides = array<i32>} : memref<1x3x8x128xf32, #tpu.memory_space<vmem>>, vector<1x1x8x128xf32>,
    %c1_i32_117 = arith.constant 1 : i32
    return
  }
  func.func @transform_0(%arg0: i32) -> i32 {
    %c0_i32 = arith.constant 0 : i32
    %c0_i32_0 = arith.constant 0 : i32
    return %c0_i32 : i32
  }
  func.func @transform_1(%arg0: i32) -> (i32, i32, i32, i32) {
    %c0_i32 = arith.constant 0 : i32
    %c0_i32_0 = arith.constant 0 : i32
    %c0_i32_1 = arith.constant 0 : i32
    %c0_i32_2 = arith.constant 0 : i32
    return %arg0, %c0_i32, %c0_i32_0, %c0_i32_1 : i32, i32, i32, i32
  }
  func.func @transform_2(%arg0: i32) -> (i32, i32, i32, i32) {
    %c0_i32 = arith.constant 0 : i32
    %c0_i32_0 = arith.constant 0 : i32
    %c0_i32_1 = arith.constant 0 : i32
    %c0_i32_2 = arith.constant 0 : i32
    return %arg0, %c0_i32, %c0_i32_0, %c0_i32_1 : i32, i32, i32, i32
  }
  func.func @transform_3(%arg0: i32) -> (i32, i32, i32, i32) {
    %c0_i32 = arith.constant 0 : i32
    %c0_i32_0 = arith.constant 0 : i32
    %c0_i32_1 = arith.constant 0 : i32
    %c0_i32_2 = arith.constant 0 : i32
    return %arg0, %c0_i32, %c0_i32_0, %c0_i32_1 : i32, i32, i32, i32
  }
}

</mosaic_0001>

<bundles_post_ra>
// kernel: transop_expm_pallas.1
= control target key start
LH: loop header
LB: loop body
LE: loop exit
PB: predicated region body
PF: predicated region fallthrough
CT: control target
= control target key end

     0   :  { %8 = vsyncpa [#allocation3], 0  ;;  %s2166_s0 = inlined_call_operand.vmem [shape: f32[54], index: 0, kind: input, shape index: {}]   ;;  %s2167_s1 = inlined_call_operand.vmem [shape: f32[1,6,8,128], index: 1, kind: input, shape index: {}]   ;;  %s2168_s2 = inlined_call_operand.vmem [shape: f32[1,3,8,128], index: 2, kind: input, shape index: {}]   ;;  %s2169_s3 = inlined_call_operand.vmem [shape: f32[1,3,8,128], index: 3, kind: output, shape index: {}]  }
   0x1   :  { %s15_s14 = sshll.u32 %s2166_s0, 4  ;;  %s16_s14 = int_to_ptr.vmem [resolvable:$true] %s15_s14 }
   0x2   :  { %s1251_s15 = scalar_lea.vmem %s16_s14, 16  ;;  %p1256_p1 = scmp.lt.s32.totalorder %s16_s14, %s16_s14 }
   0x3   :  { %p1252_p0 = scmp.ne.s32.totalorder %s16_s14, %s1251_s15  ;;  %p1257_p2 = scmp.lt.s32.totalorder %s1251_s15, %s1251_s15 }
   0x5   :  { %p1258_p3 = por %p1257_p2, %p1256_p1 }
   0x7   :  { %p1259_p4 = pnand %p1258_p3, %p1252_p0 }
   0x9   :  { %1262 = shalt.err (!%p1259_p4)
}
   0xa   :  { %s1417_s16 = smov [#allocation2]  }
   0xb   :  { %18 = dma.vmem_to_smem %s16_s14, 16, %s1417_s16, [#allocation3]  }
   0xc   :  { %1339 = dma.done.wait [#allocation3], 16  }
   0xd   :  { %1340 = vsyncadd [#allocation3], 4294967280 }
   0xe   :  { %26 = sfence }
   0xf   :  { %s36_s17 = sld [smem:[#allocation2]]  ;;  %s1039_s18 = sld [smem:[#allocation2 + $0x9]]  ;;  %v1446_v0 = vld [vmem:[%s2167_s1] sm:$0xff]  ;;  %v1455_v1 = vld [vmem:[%s2167_s1 + $0x8] sm:$0xff]  ;;  %v1464_v2 = vld [vmem:[%s2167_s1 + $0x10] sm:$0xff] }
  0x10   :  { %s1040_s19 = sld [smem:[#allocation2 + $0x12]]  ;;  %s1041_s20 = sld [smem:[#allocation2 + $0x1b]]  ;;  %v1473_v4 = vld [vmem:[%s2167_s1 + $0x18] sm:$0xff]  ;;  %v1478_v5 = vld [vmem:[%s2167_s1 + $0x20] sm:$0xff]  ;;  %v1493_v11 = vld [vmem:[%s2167_s1 + $0x28] sm:$0xff] }
  0x11   :  { %s1042_s21 = sld [smem:[#allocation2 + $0x24]]  ;;  %s1441_s22 = sld [smem:[#allocation2 + $0x2d]] }
  0x12   :  { %s1448_s24 = sld [smem:[#allocation2 + $0x1]]  ;;  %s1450_s25 = sld [smem:[#allocation2 + $0xa]] }
  0x13   :  { %s1457_s28 = sld [smem:[#allocation2 + $0x13]]  ;;  %s1459_s29 = sld [smem:[#allocation2 + $0x1c]] }
  0x14   :  { %s1466_s5 = sld [smem:[#allocation2 + $0x25]]  ;;  %s1468_s6 = sld [smem:[#allocation2 + $0x2e]] }
  0x15   :  { %v37_v3 = vstv %s36_s17  ;;  %v40_v7 = vstv %s1039_s18  ;;  %s1481_s11 = sld [smem:[#allocation2 + $0x2]]  ;;  %s1483_s12 = sld [smem:[#allocation2 + $0xb]] }
  0x16   :  { %v38_v6 = vmul.f32 %v37_v3, %v1446_v0  ;;  %v41_v8 = vmul.f32 %v40_v7, %v1455_v1  ;;  %v44_v9 = vstv %s1040_s19  ;;  %v48_v10 = vstv %s1041_s20  ;;  %s1486_s13 = sld [smem:[#allocation2 + $0x14]]  ;;  %s1488_s14 = sld [smem:[#allocation2 + $0x1d]] }
  0x17   :  { %v45_v12 = vmul.f32 %v44_v9, %v1464_v2  ;;  %v52_v13 = vstv %s1042_s21  ;;  %v56_v14 = vstv %s1441_s22  ;;  %s1497_s17 = sld [smem:[#allocation2 + $0x26]]  ;;  %v49_v16 = vmul.f32 %v48_v10, %v1473_v4  ;;  %s1502_s18 = sld [smem:[#allocation2 + $0x2f]] }
  0x18   :  { %v42_v15 = vadd.f32 %v41_v8, %v38_v6  ;;  %v53_v17 = vmul.f32 %v52_v13, %v1478_v5  ;;  %v60_v18 = vstv %s1448_s24  ;;  %s1504_s1 = sld [smem:[#allocation2 + $0x3]]  ;;  %v63_v20 = vstv %s1450_s25  ;;  %s1510_s19 = sld [smem:[#allocation2 + $0xc]] }
  0x19   :  { %v61_v19 = vmul.f32 %v60_v18, %v1446_v0  ;;  %v67_v21 = vstv %s1457_s28  ;;  %v71_v22 = vstv %s1459_s29  ;;  %s1512_s20 = sld [smem:[#allocation2 + $0x15]]  ;;  %v57_v24 = vmul.f32 %v56_v14, %v1493_v11  ;;  %s1517_s21 = sld [smem:[#allocation2 + $0x1e]] }
  0x1a   :  { %v46_v23 = vadd.f32 %v45_v12, %v42_v15  ;;  %v64_v25 = vmul.f32 %v63_v20, %v1455_v1  ;;  %v68_v26 = vmul.f32 %v67_v21, %v1464_v2  ;;  %v75_v27 = vstv %s1466_s5  ;;  %s1523_s22 = sld [smem:[#allocation2 + $0x27]]  ;;  %s1527_s0 = sld [smem:[#allocation2 + $0x30]] }
  0x1b   :  { %v79_v28 = vstv %s1468_s6  ;;  %v83_v29 = vstv %s1481_s11  ;;  %v86_v30 = vstv %s1483_s12  ;;  %v72_v33 = vmul.f32 %v71_v22, %v1473_v4  ;;  %s1529_s23 = sld [smem:[#allocation2 + $0x4]]  ;;  %s1535_s24 = sld [smem:[#allocation2 + $0xd]] }
  0x1c   :  { %v50_v31 = vadd.f32 %v49_v16, %v46_v23  ;;  %v65_v32 = vadd.f32 %v64_v25, %v61_v19  ;;  %v76_v34 = vmul.f32 %v75_v27, %v1478_v5  ;;  %v84_v35 = vmul.f32 %v83_v29, %v1446_v0  ;;  %s1537_s25 = sld [smem:[#allocation2 + $0x16]]  ;;  %s1544_s26 = sld [smem:[#allocation2 + $0x1f]] }
  0x1d   :  { %v87_v36 = vmul.f32 %v86_v30, %v1455_v1  ;;  %v90_v37 = vstv %s1486_s13  ;;  %v94_v38 = vstv %s1488_s14  ;;  %v80_v41 = vmul.f32 %v79_v28, %v1493_v11  ;;  %s1546_s27 = sld [smem:[#allocation2 + $0x28]]  ;;  %s1552_s28 = sld [smem:[#allocation2 + $0x31]] }
  0x1e   :  { %v54_v39 = vadd.f32 %v53_v17, %v50_v31  ;;  %v69_v40 = vadd.f32 %v68_v26, %v65_v32  ;;  %v91_v42 = vmul.f32 %v90_v37, %v1464_v2  ;;  %v95_v44 = vmul.f32 %v94_v38, %v1473_v4  ;;  %s1554_s29 = sld [smem:[#allocation2 + $0x5]]  ;;  %s1559_s30 = sld [smem:[#allocation2 + $0xe]] }
  0x1f   :  { %v88_v43 = vadd.f32 %v87_v36, %v84_v35  ;;  %v98_v45 = vstv %s1497_s17  ;;  %v106_v46 = vstv %s1504_s1  ;;  %v102_v50 = vstv %s1502_s18  ;;  %s1561_s4 = sld [smem:[#allocation2 + $0x17]]  ;;  %s1569_s5 = sld [smem:[#allocation2 + $0x20]] }
  0x20   :  { %v1548_v47 = vadd.f32 %v57_v24, %v54_v39  ;;  %v73_v48 = vadd.f32 %v72_v33, %v69_v40  ;;  %v99_v49 = vmul.f32 %v98_v45, %v1478_v5  ;;  %v107_v52 = vmul.f32 %v106_v46, %v1446_v0  ;;  %s1571_s6 = sld [smem:[#allocation2 + $0x29]]  ;;  %s1577_s7 = sld [smem:[#allocation2 + $0x32]] }
  0x21   :  { %v92_v51 = vadd.f32 %v91_v42, %v88_v43  ;;  %v109_v53 = vstv %s1510_s19  ;;  %v113_v54 = vstv %s1512_s20  ;;  %v117_v58 = vstv %s1517_s21  ;;  %s1582_s8 = sld [smem:[#allocation2 + $0x6]]  ;;  %s1584_s9 = sld [smem:[#allocation2 + $0xf]] }
  0x22   :  { %v77_v55 = vadd.f32 %v76_v34, %v73_v48  ;;  %v110_v56 = vmul.f32 %v109_v53, %v1455_v1  ;;  %v114_v57 = vmul.f32 %v113_v54, %v1464_v2  ;;  %v103_v60 = vmul.f32 %v102_v50, %v1493_v11  ;;  %s1589_s10 = sld [smem:[#allocation2 + $0x18]]  ;;  %s1596_s11 = sld [smem:[#allocation2 + $0x21]] }
  0x23   :  { %v96_v59 = vadd.f32 %v95_v44, %v92_v51  ;;  %v118_v61 = vmul.f32 %v117_v58, %v1473_v4  ;;  %v121_v62 = vstv %s1523_s22  ;;  %v125_v7 = vstv %s1527_s0  ;;  %s1598_s12 = sld [smem:[#allocation2 + $0x2a]]  ;;  %s1602_s13 = sld [smem:[#allocation2 + $0x33]] }
  0x24   :  { %v1573_v63 = vadd.f32 %v80_v41, %v77_v55  ;;  %v111_v3 = vadd.f32 %v110_v56, %v107_v52  ;;  %v122_v6 = vmul.f32 %v121_v62, %v1478_v5  ;;  %v129_v9 = vstv %s1529_s23  ;;  %s1608_s14 = sld [smem:[#allocation2 + $0x7]]  ;;  %s1612_s15 = sld [smem:[#allocation2 + $0x10]] }
  0x25   :  { %v100_v8 = vadd.f32 %v99_v49, %v96_v59  ;;  %v132_v10 = vstv %s1535_s24  ;;  %v136_v12 = vstv %s1537_s25  ;;  %v130_v14 = vmul.f32 %v129_v9, %v1446_v0  ;;  %s1614_s16 = sld [smem:[#allocation2 + $0x19]]  ;;  %s1620_s17 = sld [smem:[#allocation2 + $0x22]] }
  0x26   :  { %v115_v13 = vadd.f32 %v114_v57, %v111_v3  ;;  %v133_v15 = vmul.f32 %v132_v10, %v1455_v1  ;;  %v137_v16 = vmul.f32 %v136_v12, %v1464_v2  ;;  %v126_v18 = vmul.f32 %v125_v7, %v1493_v11  ;;  %s1622_s18 = sld [smem:[#allocation2 + $0x2b]]  ;;  %s1631_s1 = sld [smem:[#allocation2 + $0x34]] }
  0x27   :  { %v1591_v17 = vadd.f32 %v103_v60, %v100_v8  ;;  %v140_v19 = vstv %s1544_s26  ;;  %v144_v20 = vstv %s1546_s27  ;;  %v148_v24 = vstv %s1552_s28  ;;  %s1633_s19 = sld [smem:[#allocation2 + $0x8]]  ;;  %s1637_s20 = sld [smem:[#allocation2 + $0x11]] }
  0x28   :  { %v119_v21 = vadd.f32 %v118_v61, %v115_v13  ;;  %v134_v22 = vadd.f32 %v133_v15, %v130_v14  ;;  %v141_v23 = vmul.f32 %v140_v19, %v1473_v4  ;;  %v145_v25 = vmul.f32 %v144_v20, %v1478_v5  ;;  %s1643_s21 = sld [smem:[#allocation2 + $0x1a]]  ;;  %s1645_s22 = sld [smem:[#allocation2 + $0x23]] }
  0x29   :  { %v152_v26 = vstv %s1554_s29  ;;  %v155_v27 = vstv %s1559_s30  ;;  %v159_v28 = vstv %s1561_s4  ;;  %v149_v33 = vmul.f32 %v148_v24, %v1493_v11  ;;  %s1649_s0 = sld [smem:[#allocation2 + $0x2c]]  ;;  %s1656_s23 = sld [smem:[#allocation2 + $0x35]] }
  0x2a   :  { %v123_v29 = vadd.f32 %v122_v6, %v119_v21  ;;  %v138_v30 = vadd.f32 %v137_v16, %v134_v22  ;;  %v153_v31 = vmul.f32 %v152_v26, %v1446_v0  ;;  %v156_v32 = vmul.f32 %v155_v27, %v1455_v1 }
  0x2b   :  { %v160_v34 = vmul.f32 %v159_v28, %v1464_v2  ;;  %v163_v35 = vstv %s1569_s5  ;;  %v167_v36 = vstv %s1571_s6  ;;  %v171_v40 = vstv %s1577_s7 }
  0x2c   :  { %v142_v37 = vadd.f32 %v141_v23, %v138_v30  ;;  %v157_v38 = vadd.f32 %v156_v32, %v153_v31  ;;  %v164_v39 = vmul.f32 %v163_v35, %v1473_v4  ;;  %v1626_v41 = vadd.f32 %v126_v18, %v123_v29 }
  0x2d   :  { %v168_v42 = vmul.f32 %v167_v36, %v1478_v5  ;;  %v175_v43 = vstv %s1582_s8  ;;  %v178_v44 = vstv %s1584_s9  ;;  %v172_v50 = vmul.f32 %v171_v40, %v1493_v11 }
  0x2e   :  { %v146_v45 = vadd.f32 %v145_v25, %v142_v37  ;;  %v161_v46 = vadd.f32 %v160_v34, %v157_v38  ;;  %v176_v48 = vmul.f32 %v175_v43, %v1446_v0  ;;  %v179_v49 = vmul.f32 %v178_v44, %v1455_v1 }
  0x2f   :  { %v182_v51 = vstv %s1589_s10  ;;  %v186_v52 = vstv %s1596_s11  ;;  %v190_v53 = vstv %s1598_s12  ;;  %v194_v57 = vstv %s1602_s13 }
  0x30   :  { %v165_v54 = vadd.f32 %v164_v39, %v161_v46  ;;  %v180_v55 = vadd.f32 %v179_v49, %v176_v48  ;;  %v183_v56 = vmul.f32 %v182_v51, %v1464_v2  ;;  %v1651_v58 = vadd.f32 %v149_v33, %v146_v45 }
  0x31   :  { %v187_v59 = vmul.f32 %v186_v52, %v1473_v4  ;;  %v191_v60 = vmul.f32 %v190_v53, %v1478_v5  ;;  %v198_v61 = vstv %s1608_s14  ;;  %v201_v7 = vstv %s1612_s15 }
  0x32   :  { %v169_v62 = vadd.f32 %v168_v42, %v165_v54  ;;  %v184_v3 = vadd.f32 %v183_v56, %v180_v55  ;;  %v199_v6 = vmul.f32 %v198_v61, %v1446_v0  ;;  %v202_v8 = vmul.f32 %v201_v7, %v1455_v1 }
  0x33   :  { %v205_v9 = vstv %s1614_s16  ;;  %v209_v10 = vstv %s1620_s17  ;;  %v213_v12 = vstv %s1622_s18  ;;  %v195_v15 = vmul.f32 %v194_v57, %v1493_v11 }
  0x34   :  { %v1664_v13 = vadd.f32 %v172_v50, %v169_v62  ;;  %v188_v14 = vadd.f32 %v187_v59, %v184_v3  ;;  %v206_v16 = vmul.f32 %v205_v9, %v1464_v2  ;;  %v203_v18 = vadd.f32 %v202_v8, %v199_v6 }
  0x35   :  { %v210_v19 = vmul.f32 %v209_v10, %v1473_v4  ;;  %v217_v20 = vstv %s1631_s1  ;;  %v221_v21 = vstv %s1633_s19  ;;  %v214_v23 = vmul.f32 %v213_v12, %v1478_v5 }
  0x36   :  { %v192_v22 = vadd.f32 %v191_v60, %v188_v14  ;;  %v222_v24 = vmul.f32 %v221_v21, %v1446_v0  ;;  %v224_v25 = vstv %s1637_s20  ;;  %v207_v26 = vadd.f32 %v206_v16, %v203_v18 }
  0x37   :  { %v225_v27 = vmul.f32 %v224_v25, %v1455_v1  ;;  %v228_v28 = vstv %s1643_s21  ;;  %v232_v29 = vstv %s1645_s22  ;;  %v218_v31 = vmul.f32 %v217_v20, %v1493_v11 }
  0x38   :  { %v196_v30 = vadd.f32 %v195_v15, %v192_v22  ;;  %v229_v32 = vmul.f32 %v228_v28, %v1464_v2  ;;  %v236_v33 = vstv %s1649_s0  ;;  %v211_v34 = vadd.f32 %v210_v19, %v207_v26 }
  0x39   :  { %v226_v35 = vadd.f32 %v225_v27, %v222_v24  ;;  %v233_v36 = vmul.f32 %v232_v29, %v1473_v4  ;;  %v240_v37 = vstv %s1656_s23  ;;  %v237_v38 = vmul.f32 %v236_v33, %v1478_v5 }
  0x3a   :  { %v243_v0 = vand.u32 2147483647, %v1548_v47  ;;  %v244_v39 = vand.u32 2147483647, %v1573_v63  ;;  %v246_v1 = vand.u32 2147483647, %v1591_v17  ;;  %v215_v40 = vadd.f32 %v214_v23, %v211_v34 }
  0x3b   :  { %v230_v42 = vadd.f32 %v229_v32, %v226_v35  ;;  %v248_v43 = vand.u32 2147483647, %v1626_v41  ;;  %v249_v2 = vand.u32 2147483647, %v1651_v58  ;;  %v241_v44 = vmul.f32 %v240_v37, %v1493_v11 }
  0x3c   :  { %v245_v45 = vadd.f32 %v244_v39, %v243_v0  ;;  %v251_v4 = vand.u32 2147483647, %v1664_v13  ;;  %v219_v46 = vadd.f32 %v218_v31, %v215_v40  ;;  %v254_v49 = vand.u32 2147483647, %v196_v30 }
  0x3d   :  { %v234_v48 = vadd.f32 %v233_v36, %v230_v42  ;;  %v250_v5 = vadd.f32 %v249_v2, %v248_v43 }
  0x3e   :  { %v247_v51 = vadd.f32 %v246_v1, %v245_v45  ;;  %v255_v53 = vand.u32 2147483647, %v219_v46 }
  0x3f   :  { %v238_v50 = vadd.f32 %v237_v38, %v234_v48  ;;  %v252_v52 = vadd.f32 %v251_v4, %v250_v5 }
  0x40   :  { %v256_v55 = vadd.f32 %v255_v53, %v254_v49 }
  0x41   :  { %v242_v54 = vadd.f32 %v241_v44, %v238_v50  ;;  %v253_v56 = vmax.f32 %v247_v51, %v252_v52 }
  0x43   :  { %v257_v57 = vand.u32 2147483647, %v242_v54 }
  0x45   :  { %v258_v59 = vadd.f32 %v257_v57, %v256_v55 }
  0x47   :  { %v259_v60 = vmax.f32 %v253_v56, %v258_v59 }
  0x49   :  { %v261_v61 = vshra.s32 %v259_v60, 23 }
  0x4b   :  { %v262_v62 = vand.u32 255, %v261_v61 }
  0x4d   :  { %v1092_v11 = vadd.s32 4294967171, %v262_v62 }
  0x4f   :  { %vm264_vm0 = vcmp.gt.s32.totalorder %v1092_v11, 0 }
  0x50   :  { %v265_v3 = vsel %vm264_vm0, %v1092_v11, 0 }
  0x51   :  { %vm266_vm1 = vcmp.lt.s32.totalorder %v265_v3, 60 }
  0x52   :  { %v1690_v6 = vsel %vm266_vm1, %v265_v3, 60 }
  0x53   :  { %v891_v7 = vshra.s32 %v1690_v6, 16  ;;  %v268_v9 = vsub.s32 127, %v1690_v6  ;;  %vm724_vm3 = vcmp.gt.s32.totalorder %v1690_v6, 0  ;;  %vm776_vm4 = vcmp.gt.s32.totalorder %v1690_v6, 1 }
  0x54   :  { %vm828_vm5 = vcmp.gt.s32.totalorder %v1690_v6, 2  ;;  %vm880_vm6 = vcmp.gt.s32.totalorder %v1690_v6, 3 }
  0x55   :  { %v1693_v8 = vcvt.s32.f32 %v891_v7  ;;  %v269_v10 = vshll.u32 %v268_v9, 23 }
  0x57   :  { %894 = vmax.xlane.f32.xlu0 %v1693_v8  ;;  %v1698_v12 = vmul.f32 %v269_v10, %v1548_v47  ;;  %v1701_v14 = vmul.f32 %v269_v10, %v1651_v58  ;;  %v1704_v15 = vmul.f32 %v269_v10, %v1573_v63  ;;  %v1707_v16 = vmul.f32 %v269_v10, %v1626_v41 }
  0x58   :  { %v1711_v20 = vmul.f32 %v269_v10, %v196_v30  ;;  %v1713_v21 = vmul.f32 %v269_v10, %v219_v46  ;;  %v890_v58 = vand.u32 65535, %v1690_v6  ;;  %v1719_v24 = vmul.f32 %v269_v10, %v1591_v17 }
  0x59   :  { %v280_v18 = vmul.f32 0.125, %v1698_v12  ;;  %v285_v19 = vmul.f32 0.125, %v1701_v14  ;;  %v282_v47 = vmul.f32 0.125, %v1704_v15  ;;  %v284_v23 = vmul.f32 0.125, %v1707_v16 }
  0x5a   :  { %v1722_v41 = vmul.f32 %v269_v10, %v1664_v13  ;;  %v288_v25 = vmul.f32 0.125, %v1711_v20  ;;  %v289_v26 = vmul.f32 0.125, %v1713_v21  ;;  %v1736_v37 = vmul.f32 %v269_v10, %v242_v54 }
  0x5b   :  { %v281_v22 = vadd.f32 1.0, %v280_v18  ;;  %v286_v63 = vadd.f32 1.0, %v285_v19  ;;  %v293_v28 = vmul.f32 %v284_v23, %v1704_v15  ;;  %v312_v29 = vmul.f32 %v282_v47, %v1707_v16 }
  0x5c   :  { %v295_v31 = vmul.f32 %v288_v25, %v1719_v24  ;;  %v297_v17 = vmul.f32 %v282_v47, %v1698_v12  ;;  %v308_v34 = vmul.f32 %v284_v23, %v1701_v14  ;;  %v315_v36 = vmul.f32 %v289_v26, %v1722_v41 }
  0x5d   :  { %v292_v27 = vmul.f32 %v281_v22, %v1698_v12  ;;  %v313_v30 = vmul.f32 %v286_v63, %v1701_v14  ;;  %v298_v32 = vmul.f32 %v286_v63, %v1704_v15  ;;  %v307_v13 = vmul.f32 %v281_v22, %v1707_v16 }
  0x5e   :  { %v300_v0 = vmul.f32 %v289_v26, %v1719_v24  ;;  %v310_v39 = vmul.f32 %v288_v25, %v1722_v41  ;;  %v322_v43 = vmul.f32 %v281_v22, %v1711_v20  ;;  %v323_v44 = vmul.f32 %v284_v23, %v1713_v21 }
  0x5f   :  { %v294_v33 = vadd.f32 %v293_v28, %v292_v27  ;;  %v314_v35 = vadd.f32 %v313_v30, %v312_v29  ;;  %v299_v38 = vadd.f32 %v298_v32, %v297_v17  ;;  %v309_v40 = vadd.f32 %v308_v34, %v307_v13 }
  0x60   :  { %v325_v45 = vmul.f32 %v288_v25, %v1736_v37  ;;  %v327_v4 = vmul.f32 %v282_v47, %v1711_v20  ;;  %v328_v48 = vmul.f32 %v286_v63, %v1713_v21  ;;  %v330_v5 = vmul.f32 %v289_v26, %v1736_v37 }
  0x61   :  { %v296_v1 = vadd.f32 %v295_v31, %v294_v33  ;;  %v316_v42 = vadd.f32 %v315_v36, %v314_v35  ;;  %v301_v2 = vadd.f32 %v300_v0, %v299_v38  ;;  %v311_v46 = vadd.f32 %v310_v39, %v309_v40 }
  0x62   :  { %v324_v50 = vadd.f32 %v323_v44, %v322_v43  ;;  %v329_v53 = vadd.f32 %v328_v48, %v327_v4  ;;  %v892_v56 = vcvt.s32.f32 %v890_v58  ;;  %v283_v3 = vmul.f32 0.125, %v1719_v24 }
  0x63   :  { %v337_v49 = vmul.f32 0.14285715, %v296_v1  ;;  %v1746_v51 = vmul.f32 0.14285715, %v301_v2  ;;  %v342_v52 = vmul.f32 0.14285715, %v316_v42 }
  0x64   :  { %v341_v55 = vmul.f32 0.14285715, %v311_v46  ;;  %v326_v57 = vadd.f32 %v325_v45, %v324_v50  ;;  %v331_v60 = vadd.f32 %v330_v5, %v329_v53  ;;  %v287_v7 = vmul.f32 0.125, %v1722_v41 }
  0x65   :  { %v338_v54 = vadd.f32 1.0, %v337_v49  ;;  %v343_v59 = vadd.f32 1.0, %v342_v52  ;;  %v369_v11 = vmul.f32 %v1746_v51, %v1707_v16  ;;  %v290_v9 = vmul.f32 0.125, %v1736_v37 }
  0x66   :  { %v350_v62 = vmul.f32 %v341_v55, %v1704_v15  ;;  %v345_v10 = vmul.f32 0.14285715, %v326_v57  ;;  %v346_v19 = vmul.f32 0.14285715, %v331_v60  ;;  %v354_v47 = vmul.f32 %v1746_v51, %v1698_v12 }
  0x67   :  { %v349_v61 = vmul.f32 %v338_v54, %v1698_v12  ;;  %v355_v58 = vmul.f32 %v343_v59, %v1704_v15  ;;  %v291_v23 = vadd.f32 1.0, %v290_v9  ;;  %v302_v63 = vmul.f32 %v283_v3, %v1698_v12 }
  0x68   :  { %v303_v25 = vmul.f32 %v287_v7, %v1704_v15  ;;  %v317_v27 = vmul.f32 %v283_v3, %v1707_v16  ;;  %v318_v28 = vmul.f32 %v287_v7, %v1701_v14  ;;  %v332_v29 = vmul.f32 %v283_v3, %v1711_v20 }
  0x69   :  { %v351_v22 = vadd.f32 %v350_v62, %v349_v61  ;;  %v305_v31 = vmul.f32 %v291_v23, %v1719_v24  ;;  %v320_v17 = vmul.f32 %v291_v23, %v1722_v41  ;;  %v335_v13 = vmul.f32 %v291_v23, %v1736_v37 }
  0x6a   :  { %v304_v30 = vadd.f32 %v303_v25, %v302_v63  ;;  %v319_v32 = vadd.f32 %v318_v28, %v317_v27  ;;  %v352_v33 = vmul.f32 %v345_v10, %v1719_v24  ;;  %v356_v34 = vadd.f32 %v355_v58, %v354_v47 }
  0x6b   :  { %v357_v38 = vmul.f32 %v346_v19, %v1719_v24  ;;  %v364_v0 = vmul.f32 %v338_v54, %v1707_v16  ;;  %v365_v40 = vmul.f32 %v341_v55, %v1701_v14  ;;  %v367_v42 = vmul.f32 %v345_v10, %v1722_v41 }
  0x6c   :  { %v306_v35 = vadd.f32 %v305_v31, %v304_v30  ;;  %v321_v39 = vadd.f32 %v320_v17, %v319_v32  ;;  %v353_v1 = vadd.f32 %v352_v33, %v351_v22  ;;  %v370_v45 = vmul.f32 %v343_v59, %v1701_v14  ;;  %v1807_v31 = vld [vmem:[%s2168_s2 + $0x10] sm:$0xff] }
  0x6d   :  { %v358_v44 = vadd.f32 %v357_v38, %v356_v34  ;;  %v366_v46 = vadd.f32 %v365_v40, %v364_v0  ;;  %v372_v48 = vmul.f32 %v346_v19, %v1722_v41  ;;  %v379_v5 = vmul.f32 %v338_v54, %v1711_v20 }
  0x6e   :  { %v340_v2 = vmul.f32 0.14285715, %v306_v35  ;;  %v344_v4 = vmul.f32 0.14285715, %v321_v39  ;;  %v371_v52 = vadd.f32 %v370_v45, %v369_v11  ;;  %v380_v61 = vmul.f32 %v341_v55, %v1713_v21 }
  0x6f   :  { %v368_v57 = vadd.f32 %v367_v42, %v366_v46  ;;  %v384_v54 = vmul.f32 %v1746_v51, %v1711_v20  ;;  %v385_v11 = vmul.f32 %v343_v59, %v1713_v21  ;;  %v387_v63 = vmul.f32 %v346_v19, %v1736_v37  ;;  %v1797_v59 = vld [vmem:[%s2168_s2] sm:$0xff]  ;;  %v1802_v19 = vld [vmem:[%s2168_s2 + $0x8] sm:$0xff] }
  0x70   :  { %v359_v50 = vmul.f32 %v340_v2, %v1698_v12  ;;  %v374_v53 = vmul.f32 %v340_v2, %v1707_v16  ;;  %v375_v60 = vmul.f32 %v344_v4, %v1701_v14  ;;  %v373_v3 = vadd.f32 %v372_v48, %v371_v52 }
  0x71   :  { %v381_v47 = vadd.f32 %v380_v61, %v379_v5  ;;  %v389_v55 = vmul.f32 %v340_v2, %v1711_v20  ;;  %v396_v30 = vmul.f32 0.16666667, %v358_v44  ;;  %v398_v32 = vmul.f32 0.16666667, %v368_v57 }
  0x72   :  { %v376_v22 = vadd.f32 %v375_v60, %v374_v53  ;;  %v399_v34 = vmul.f32 0.16666667, %v373_v3 }
  0x73   :  { %v411_v35 = vmul.f32 %v396_v30, %v1698_v12  ;;  %v407_v42 = vmul.f32 %v398_v32, %v1704_v15 }
  0xe4   :  { %v1755_v18 = vpop.xlane.xlu0 %894 }
  0xe5   :  { %vm896_vm2 = vcmp.eq.f32.partialorder %v1693_v8, %v1755_v18  ;;  %v333_v8 = vmul.f32 %v287_v7, %v1713_v21  ;;  %v382_v7 = vmul.f32 %v345_v10, %v1736_v37  ;;  %v390_v10 = vmul.f32 %v344_v4, %v1713_v21 }
  0xe6   :  { %v897_v26 = vsel %vm896_vm2, %v892_v56, -inf  ;;  %v360_v56 = vmul.f32 %v344_v4, %v1704_v15 }
  0xe7   :  { %898 = vmax.xlane.f32.xlu0 %v897_v26  ;;  %v334_v36 = vadd.f32 %v333_v8, %v332_v29  ;;  %v383_v25 = vadd.f32 %v382_v7, %v381_v47  ;;  %v386_v26 = vadd.f32 %v385_v11, %v384_v54  ;;  %v394_v29 = vmul.f32 0.16666667, %v353_v1 }
  0xe8   :  { %v361_v9 = vadd.f32 %v360_v56, %v359_v50  ;;  %v391_v8 = vadd.f32 %v390_v10, %v389_v55  ;;  %v400_v1 = vadd.f32 1.0, %v399_v34  ;;  %v426_v56 = vmul.f32 %v396_v30, %v1707_v16 }
  0xe9   :  { %v336_v43 = vadd.f32 %v335_v13, %v334_v36  ;;  %v388_v17 = vadd.f32 %v387_v63, %v386_v26  ;;  %v395_v13 = vadd.f32 1.0, %v394_v29  ;;  %v402_v0 = vmul.f32 0.16666667, %v383_v25 }
  0xea   :  { %v412_v48 = vmul.f32 %v400_v1, %v1704_v15  ;;  %v437_v25 = vmul.f32 %v398_v32, %v1713_v21 }
  0xeb   :  { %v347_v49 = vmul.f32 0.14285715, %v336_v43  ;;  %v403_v39 = vmul.f32 0.16666667, %v388_v17  ;;  %v406_v40 = vmul.f32 %v395_v13, %v1698_v12  ;;  %v409_v44 = vmul.f32 %v402_v0, %v1719_v24 }
  0xec   :  { %v421_v5 = vmul.f32 %v395_v13, %v1707_v16  ;;  %v424_v53 = vmul.f32 %v402_v0, %v1722_v41  ;;  %v413_v60 = vadd.f32 %v412_v48, %v411_v35  ;;  %v436_v55 = vmul.f32 %v395_v13, %v1711_v20 }
  0xed   :  { %v348_v62 = vadd.f32 1.0, %v347_v49  ;;  %v414_v45 = vmul.f32 %v403_v39, %v1719_v24  ;;  %v408_v46 = vadd.f32 %v407_v42, %v406_v40  ;;  %v422_v49 = vmul.f32 %v398_v32, %v1701_v14 }
  0xee   :  { %v429_v7 = vmul.f32 %v403_v39, %v1722_v41  ;;  %v439_v10 = vmul.f32 %v402_v0, %v1736_v37  ;;  %v438_v29 = vadd.f32 %v437_v25, %v436_v55  ;;  %v444_v17 = vmul.f32 %v403_v39, %v1736_v37 }
  0xef   :  { %v362_v58 = vmul.f32 %v348_v62, %v1719_v24  ;;  %v377_v23 = vmul.f32 %v348_v62, %v1722_v41  ;;  %v392_v27 = vmul.f32 %v348_v62, %v1736_v37  ;;  %v410_v57 = vadd.f32 %v409_v44, %v408_v46 }
  0xf0   :  { %v423_v61 = vadd.f32 %v422_v49, %v421_v5  ;;  %v427_v62 = vmul.f32 %v400_v1, %v1701_v14  ;;  %v440_v32 = vadd.f32 %v439_v10, %v438_v29 }
  0xf1   :  { %v363_v51 = vadd.f32 %v362_v58, %v361_v9  ;;  %v378_v28 = vadd.f32 %v377_v23, %v376_v22  ;;  %v393_v36 = vadd.f32 %v392_v27, %v391_v8  ;;  %v415_v22 = vadd.f32 %v414_v45, %v413_v60 }
  0xf2   :  { %v425_v47 = vadd.f32 %v424_v53, %v423_v61  ;;  %v428_v11 = vadd.f32 %v427_v62, %v426_v56  ;;  %v441_v27 = vmul.f32 %v396_v30, %v1711_v20  ;;  %v459_v45 = vmul.f32 0.2, %v440_v32 }
  0xf3   :  { %v397_v33 = vmul.f32 0.16666667, %v363_v51  ;;  %v401_v38 = vmul.f32 0.16666667, %v378_v28  ;;  %v404_v2 = vmul.f32 0.16666667, %v393_v36  ;;  %v442_v51 = vmul.f32 %v400_v1, %v1713_v21 }
  0xf4   :  { %v430_v26 = vadd.f32 %v429_v7, %v428_v11  ;;  %v451_v36 = vmul.f32 0.2, %v410_v57  ;;  %v453_v40 = vmul.f32 0.2, %v415_v22  ;;  %v455_v0 = vmul.f32 0.2, %v425_v47 }
  0xf5   :  { %v416_v43 = vmul.f32 %v397_v33, %v1698_v12  ;;  %v417_v4 = vmul.f32 %v401_v38, %v1704_v15  ;;  %v405_v50 = vadd.f32 1.0, %v404_v2  ;;  %v431_v54 = vmul.f32 %v397_v33, %v1707_v16 }
  0xf6   :  { %v432_v9 = vmul.f32 %v401_v38, %v1701_v14  ;;  %v446_v8 = vmul.f32 %v397_v33, %v1711_v20  ;;  %v443_v34 = vadd.f32 %v442_v51, %v441_v27  ;;  %v447_v35 = vmul.f32 %v401_v38, %v1713_v21 }
  0xf7   :  { %v418_v52 = vadd.f32 %v417_v4, %v416_v43  ;;  %v419_v3 = vmul.f32 %v405_v50, %v1719_v24  ;;  %v434_v58 = vmul.f32 %v405_v50, %v1722_v41  ;;  %v449_v13 = vmul.f32 %v405_v50, %v1736_v37 }
  0xf8   :  { %v433_v63 = vadd.f32 %v432_v9, %v431_v54  ;;  %v445_v43 = vadd.f32 %v444_v17, %v443_v34  ;;  %v448_v30 = vadd.f32 %v447_v35, %v446_v8  ;;  %v452_v2 = vadd.f32 1.0, %v451_v36 }
  0xf9   :  { %v420_v23 = vadd.f32 %v419_v3, %v418_v52  ;;  %v456_v1 = vmul.f32 0.2, %v430_v26  ;;  %v464_v39 = vmul.f32 %v455_v0, %v1704_v15  ;;  %v468_v33 = vmul.f32 %v453_v40, %v1698_v12 }
  0xfa   :  { %v435_v28 = vadd.f32 %v434_v58, %v433_v63  ;;  %v450_v4 = vadd.f32 %v449_v13, %v448_v30  ;;  %v460_v38 = vmul.f32 0.2, %v445_v43  ;;  %v463_v48 = vmul.f32 %v452_v2, %v1698_v12 }
  0xfb   :  { %v454_v42 = vmul.f32 0.2, %v420_v23  ;;  %v457_v46 = vadd.f32 1.0, %v456_v1  ;;  %v466_v5 = vmul.f32 %v459_v45, %v1719_v24  ;;  %v478_v52 = vmul.f32 %v452_v2, %v1707_v16 }
  0xfc   :  { %v458_v44 = vmul.f32 0.2, %v435_v28  ;;  %v461_v53 = vmul.f32 0.2, %v450_v4  ;;  %v465_v56 = vadd.f32 %v464_v39, %v463_v48  ;;  %v471_v60 = vmul.f32 %v460_v38, %v1719_v24 }
  0xfd   :  { %v473_v49 = vmul.f32 %v454_v42, %v1698_v12  ;;  %v469_v57 = vmul.f32 %v457_v46, %v1704_v15  ;;  %v479_v62 = vmul.f32 %v455_v0, %v1701_v14  ;;  %v481_v3 = vmul.f32 %v459_v45, %v1722_v41 }
  0xfe   :  { %v474_v50 = vmul.f32 %v458_v44, %v1704_v15  ;;  %v483_v7 = vmul.f32 %v453_v40, %v1707_v16  ;;  %v462_v54 = vadd.f32 1.0, %v461_v53  ;;  %v467_v9 = vadd.f32 %v466_v5, %v465_v56 }
  0xff   :  { %v470_v22 = vadd.f32 %v469_v57, %v468_v33  ;;  %v484_v47 = vmul.f32 %v457_v46, %v1701_v14  ;;  %v480_v11 = vadd.f32 %v479_v62, %v478_v52  ;;  %v486_v58 = vmul.f32 %v460_v38, %v1722_v41 }
 0x100   :  { %v475_v61 = vadd.f32 %v474_v50, %v473_v49  ;;  %v488_v23 = vmul.f32 %v454_v42, %v1707_v16  ;;  %v489_v63 = vmul.f32 %v458_v44, %v1701_v14  ;;  %v476_v25 = vmul.f32 %v462_v54, %v1719_v24 }
 0x101   :  { %v472_v55 = vadd.f32 %v471_v60, %v470_v22  ;;  %v485_v26 = vadd.f32 %v484_v47, %v483_v7  ;;  %v491_v10 = vmul.f32 %v462_v54, %v1722_v41  ;;  %v482_v27 = vadd.f32 %v481_v3, %v480_v11 }
 0x102   :  { %v490_v51 = vadd.f32 %v489_v63, %v488_v23  ;;  %v493_v28 = vmul.f32 %v452_v2, %v1711_v20  ;;  %v494_v29 = vmul.f32 %v455_v0, %v1713_v21  ;;  %v477_v17 = vadd.f32 %v476_v25, %v475_v61 }
 0x103   :  { %v487_v8 = vadd.f32 %v486_v58, %v485_v26  ;;  %v496_v34 = vmul.f32 %v459_v45, %v1736_v37  ;;  %v498_v35 = vmul.f32 %v453_v40, %v1711_v20  ;;  %v499_v32 = vmul.f32 %v457_v46, %v1713_v21 }
 0x104   :  { %v492_v13 = vadd.f32 %v491_v10, %v490_v51  ;;  %v495_v36 = vadd.f32 %v494_v29, %v493_v28  ;;  %v501_v43 = vmul.f32 %v460_v38, %v1736_v37  ;;  %v503_v30 = vmul.f32 %v454_v42, %v1711_v20 }
 0x105   :  { %v504_v1 = vmul.f32 %v458_v44, %v1713_v21  ;;  %v506_v2 = vmul.f32 %v462_v54, %v1736_v37  ;;  %v508_v39 = vmul.f32 0.25, %v467_v9  ;;  %v500_v33 = vadd.f32 %v499_v32, %v498_v35 }
 0x106   :  { %v497_v0 = vadd.f32 %v496_v34, %v495_v36  ;;  %v510_v4 = vmul.f32 0.25, %v472_v55  ;;  %v511_v48 = vmul.f32 0.25, %v477_v17  ;;  %v512_v40 = vmul.f32 0.25, %v482_v27 }
 0x107   :  { %v505_v45 = vadd.f32 %v504_v1, %v503_v30  ;;  %v509_v5 = vadd.f32 1.0, %v508_v39  ;;  %v513_v49 = vmul.f32 0.25, %v487_v8  ;;  %v502_v50 = vadd.f32 %v501_v43, %v500_v33 }
 0x108   :  { %v515_v52 = vmul.f32 0.25, %v492_v13  ;;  %v516_v46 = vmul.f32 0.25, %v497_v0  ;;  %v525_v38 = vmul.f32 %v510_v4, %v1698_v12  ;;  %v521_v56 = vmul.f32 %v512_v40, %v1704_v15 }
 0x109   :  { %v507_v53 = vadd.f32 %v506_v2, %v505_v45  ;;  %v514_v42 = vadd.f32 1.0, %v513_v49  ;;  %v520_v44 = vmul.f32 %v509_v5, %v1698_v12  ;;  %v517_v57 = vmul.f32 0.25, %v502_v50 }
 0x10a   :  { %v523_v60 = vmul.f32 %v516_v46, %v1719_v24  ;;  %v530_v61 = vmul.f32 %v511_v48, %v1698_v12  ;;  %v531_v62 = vmul.f32 %v515_v52, %v1704_v15  ;;  %v535_v9 = vmul.f32 %v509_v5, %v1707_v16 }
 0x10b   :  { %v518_v3 = vmul.f32 0.25, %v507_v53  ;;  %v522_v7 = vadd.f32 %v521_v56, %v520_v44  ;;  %v526_v54 = vmul.f32 %v514_v42, %v1704_v15  ;;  %v528_v22 = vmul.f32 %v517_v57, %v1719_v24 }
 0x10c   :  { %v532_v47 = vadd.f32 %v531_v62, %v530_v61  ;;  %v536_v11 = vmul.f32 %v512_v40, %v1701_v14  ;;  %v538_v58 = vmul.f32 %v516_v46, %v1722_v41  ;;  %v540_v25 = vmul.f32 %v510_v4, %v1707_v16 }
 0x10d   :  { %v519_v23 = vadd.f32 1.0, %v518_v3  ;;  %v524_v63 = vadd.f32 %v523_v60, %v522_v7  ;;  %v527_v55 = vadd.f32 %v526_v54, %v525_v38  ;;  %v541_v10 = vmul.f32 %v514_v42, %v1701_v14 }
 0x10e   :  { %v537_v26 = vadd.f32 %v536_v11, %v535_v9  ;;  %v543_v27 = vmul.f32 %v517_v57, %v1722_v41  ;;  %v545_v51 = vmul.f32 %v511_v48, %v1707_v16  ;;  %v546_v17 = vmul.f32 %v515_v52, %v1701_v14 }
 0x10f   :  { %v529_v28 = vadd.f32 %v528_v22, %v527_v55  ;;  %v533_v29 = vmul.f32 %v519_v23, %v1719_v24  ;;  %v548_v8 = vmul.f32 %v519_v23, %v1722_v41  ;;  %v542_v35 = vadd.f32 %v541_v10, %v540_v25 }
 0x110   :  { %v539_v34 = vadd.f32 %v538_v58, %v537_v26  ;;  %v550_v13 = vmul.f32 %v509_v5, %v1711_v20  ;;  %v551_v36 = vmul.f32 %v512_v40, %v1713_v21  ;;  %v547_v43 = vadd.f32 %v546_v17, %v545_v51 }
 0x111   :  { %v534_v32 = vadd.f32 %v533_v29, %v532_v47  ;;  %v553_v30 = vmul.f32 %v516_v46, %v1736_v37  ;;  %v555_v1 = vmul.f32 %v510_v4, %v1711_v20  ;;  %v544_v2 = vadd.f32 %v543_v27, %v542_v35 }
 0x112   :  { %v552_v39 = vadd.f32 %v551_v36, %v550_v13  ;;  %v556_v0 = vmul.f32 %v514_v42, %v1713_v21  ;;  %v558_v33 = vmul.f32 %v517_v57, %v1736_v37  ;;  %v549_v45 = vadd.f32 %v548_v8, %v547_v43 }
 0x113   :  { %v560_v49 = vmul.f32 %v511_v48, %v1711_v20  ;;  %v561_v50 = vmul.f32 %v515_v52, %v1713_v21  ;;  %v563_v5 = vmul.f32 %v519_v23, %v1736_v37  ;;  %v565_v53 = vmul.f32 0.33333334, %v524_v63 }
 0x114   :  { %v554_v40 = vadd.f32 %v553_v30, %v552_v39  ;;  %v557_v38 = vadd.f32 %v556_v0, %v555_v1  ;;  %v567_v44 = vmul.f32 0.33333334, %v529_v28  ;;  %v568_v56 = vmul.f32 0.33333334, %v534_v32 }
 0x115   :  { %v562_v46 = vadd.f32 %v561_v50, %v560_v49  ;;  %v569_v4 = vmul.f32 0.33333334, %v539_v34  ;;  %v570_v60 = vmul.f32 0.33333334, %v544_v2  ;;  %v566_v62 = vadd.f32 1.0, %v565_v53 }
 0x116   :  { %v559_v61 = vadd.f32 %v558_v33, %v557_v38  ;;  %v572_v42 = vmul.f32 0.33333334, %v549_v45  ;;  %v573_v3 = vmul.f32 0.33333334, %v554_v40  ;;  %v582_v52 = vmul.f32 %v567_v44, %v1698_v12 }
 0x117   :  { %v564_v57 = vadd.f32 %v563_v5, %v562_v46  ;;  %v571_v7 = vadd.f32 1.0, %v570_v60  ;;  %v578_v48 = vmul.f32 %v569_v4, %v1704_v15  ;;  %v577_v9 = vmul.f32 %v566_v62, %v1698_v12 }
 0x118   :  { %v574_v54 = vmul.f32 0.33333334, %v559_v61  ;;  %v580_v22 = vmul.f32 %v573_v3, %v1719_v24  ;;  %v587_v47 = vmul.f32 %v568_v56, %v1698_v12  ;;  %v588_v23 = vmul.f32 %v572_v42, %v1704_v15 }
 0x119   :  { %v575_v11 = vmul.f32 0.33333334, %v564_v57  ;;  %v583_v58 = vmul.f32 %v571_v7, %v1704_v15  ;;  %v592_v63 = vmul.f32 %v566_v62, %v1707_v16  ;;  %v579_v55 = vadd.f32 %v578_v48, %v577_v9 }
 0x11a   :  { %v585_v25 = vmul.f32 %v574_v54, %v1719_v24  ;;  %v593_v26 = vmul.f32 %v569_v4, %v1701_v14  ;;  %v595_v10 = vmul.f32 %v573_v3, %v1722_v41  ;;  %v589_v28 = vadd.f32 %v588_v23, %v587_v47 }
 0x11b   :  { %v576_v27 = vadd.f32 1.0, %v575_v11  ;;  %v584_v51 = vadd.f32 %v583_v58, %v582_v52  ;;  %v597_v29 = vmul.f32 %v567_v44, %v1707_v16  ;;  %v581_v17 = vadd.f32 %v580_v22, %v579_v55 }
 0x11c   :  { %v594_v8 = vadd.f32 %v593_v26, %v592_v63  ;;  %v598_v34 = vmul.f32 %v571_v7, %v1701_v14  ;;  %v600_v35 = vmul.f32 %v574_v54, %v1722_v41  ;;  %v602_v32 = vmul.f32 %v568_v56, %v1707_v16 }
 0x11d   :  { %v586_v13 = vadd.f32 %v585_v25, %v584_v51  ;;  %v590_v36 = vmul.f32 %v576_v27, %v1719_v24  ;;  %v603_v43 = vmul.f32 %v572_v42, %v1701_v14  ;;  %v605_v2 = vmul.f32 %v576_v27, %v1722_v41 }
 0x11e   :  { %v596_v30 = vadd.f32 %v595_v10, %v594_v8  ;;  %v599_v1 = vadd.f32 %v598_v34, %v597_v29  ;;  %v607_v39 = vmul.f32 %v566_v62, %v1711_v20  ;;  %v608_v45 = vmul.f32 %v569_v4, %v1713_v21 }
 0x11f   :  { %v591_v0 = vadd.f32 %v590_v36, %v589_v28  ;;  %v604_v33 = vadd.f32 %v603_v43, %v602_v32  ;;  %v610_v49 = vmul.f32 %v573_v3, %v1736_v37  ;;  %v612_v5 = vmul.f32 %v567_v44, %v1711_v20 }
 0x120   :  { %v601_v50 = vadd.f32 %v600_v35, %v599_v1  ;;  %v613_v40 = vmul.f32 %v571_v7, %v1713_v21  ;;  %v615_v38 = vmul.f32 %v574_v54, %v1736_v37  ;;  %v609_v46 = vadd.f32 %v608_v45, %v607_v39 }
 0x121   :  { %v606_v53 = vadd.f32 %v605_v2, %v604_v33  ;;  %v617_v60 = vmul.f32 %v568_v56, %v1711_v20  ;;  %v618_v61 = vmul.f32 %v572_v42, %v1713_v21  ;;  %v620_v57 = vmul.f32 %v576_v27, %v1736_v37 }
 0x122   :  { %v614_v62 = vadd.f32 %v613_v40, %v612_v5  ;;  %v622_v48 = vmul.f32 0.5, %v581_v17  ;;  %v624_v4 = vmul.f32 0.5, %v586_v13  ;;  %v611_v52 = vadd.f32 %v610_v49, %v609_v46 }
 0x123   :  { %v619_v3 = vadd.f32 %v618_v61, %v617_v60  ;;  %v625_v9 = vmul.f32 0.5, %v591_v0  ;;  %v626_v22 = vmul.f32 0.5, %v596_v30  ;;  %v627_v7 = vmul.f32 0.5, %v601_v50 }
 0x124   :  { %v616_v44 = vadd.f32 %v615_v38, %v614_v62  ;;  %v623_v47 = vadd.f32 1.0, %v622_v48  ;;  %v629_v11 = vmul.f32 0.5, %v606_v53  ;;  %v630_v58 = vmul.f32 0.5, %v611_v52 }
 0x125   :  { %v621_v54 = vadd.f32 %v620_v57, %v619_v3  ;;  %v635_v23 = vmul.f32 %v626_v22, %v1704_v15  ;;  %v639_v56 = vmul.f32 %v624_v4, %v1698_v12  ;;  %v628_v42 = vadd.f32 1.0, %v627_v7 }
 0x126   :  { %v631_v63 = vmul.f32 0.5, %v616_v44  ;;  %v634_v55 = vmul.f32 %v623_v47, %v1698_v12  ;;  %v644_v25 = vmul.f32 %v625_v9, %v1698_v12  ;;  %v637_v10 = vmul.f32 %v630_v58, %v1719_v24 }
 0x127   :  { %v632_v26 = vmul.f32 0.5, %v621_v54  ;;  %v645_v27 = vmul.f32 %v629_v11, %v1704_v15  ;;  %v649_v51 = vmul.f32 %v623_v47, %v1707_v16  ;;  %v640_v29 = vmul.f32 %v628_v42, %v1704_v15 }
 0x128   :  { %v636_v28 = vadd.f32 %v635_v23, %v634_v55  ;;  %v642_v17 = vmul.f32 %v631_v63, %v1719_v24  ;;  %v650_v8 = vmul.f32 %v626_v22, %v1701_v14  ;;  %v652_v13 = vmul.f32 %v630_v58, %v1722_v41 }
 0x129   :  { %v633_v34 = vadd.f32 1.0, %v632_v26  ;;  %v646_v35 = vadd.f32 %v645_v27, %v644_v25  ;;  %v654_v12 = vmul.f32 %v624_v4, %v1707_v16  ;;  %v641_v32 = vadd.f32 %v640_v29, %v639_v56 }
 0x12a   :  { %v638_v36 = vadd.f32 %v637_v10, %v636_v28  ;;  %v651_v43 = vadd.f32 %v650_v8, %v649_v51  ;;  %v655_v30 = vmul.f32 %v628_v42, %v1701_v14  ;;  %v657_v2 = vmul.f32 %v631_v63, %v1722_v41 }
 0x12b   :  { %v647_v1 = vmul.f32 %v633_v34, %v1719_v24  ;;  %v659_v15 = vmul.f32 %v625_v9, %v1707_v16  ;;  %v660_v39 = vmul.f32 %v629_v11, %v1701_v14  ;;  %v1934_v0 = vadd.f32 %v642_v17, %v641_v32 }
 0x12c   :  { %v1936_v33 = vadd.f32 %v652_v13, %v651_v43  ;;  %v656_v45 = vadd.f32 %v655_v30, %v654_v12  ;;  %v662_v49 = vmul.f32 %v633_v34, %v1722_v41  ;;  %v664_v40 = vmul.f32 %v623_v47, %v1711_v20 }
 0x12d   :  { %v1939_v50 = vadd.f32 %v647_v1, %v646_v35  ;;  %v661_v5 = vadd.f32 %v660_v39, %v659_v15  ;;  %v665_v24 = vmul.f32 %v626_v22, %v1713_v21  ;;  %v667_v53 = vmul.f32 %v630_v58, %v1736_v37 }
 0x12e   :  { %v658_v38 = vadd.f32 %v657_v2, %v656_v45  ;;  %v669_v16 = vmul.f32 %v624_v4, %v1711_v20  ;;  %v670_v14 = vmul.f32 %v628_v42, %v1713_v21  ;;  %v672_v61 = vmul.f32 %v631_v63, %v1736_v37 }
 0x12f   :  { %v1946_v46 = vadd.f32 %v662_v49, %v661_v5  ;;  %v666_v60 = vadd.f32 %v665_v24, %v664_v40  ;;  %v674_v41 = vmul.f32 %v625_v9, %v1711_v20  ;;  %v675_v57 = vmul.f32 %v629_v11, %v1713_v21 }
 0x130   :  { %v671_v62 = vadd.f32 %v670_v14, %v669_v16  ;;  %v677_v48 = vmul.f32 %v633_v34, %v1736_v37  ;;  %v679_v52 = vadd.f32 1.0, %v638_v36  ;;  %v680_v22 = vadd.f32 1.0, %v658_v38 }
 0x131   :  { %v668_v3 = vadd.f32 %v667_v53, %v666_v60  ;;  %v683_v4 = vmul.f32 %v1936_v33, %v1934_v0  ;;  %v693_v44 = vmul.f32 %v1946_v46, %v1934_v0  ;;  %v676_v7 = vadd.f32 %v675_v57, %v674_v41 }
 0x132   :  { %v673_v47 = vadd.f32 %v672_v61, %v671_v62  ;;  %v682_v54 = vmul.f32 %v679_v52, %v679_v52  ;;  %v687_v20 = vmul.f32 %v679_v52, %v1934_v0  ;;  %v688_v37 = vmul.f32 %v680_v22, %v1934_v0 }
 0x133   :  { %v685_v21 = vmul.f32 %v668_v3, %v1939_v50  ;;  %v692_v9 = vmul.f32 %v679_v52, %v1939_v50  ;;  %v697_v11 = vmul.f32 %v679_v52, %v1936_v33  ;;  %v678_v58 = vadd.f32 %v677_v48, %v676_v7 }
 0x134   :  { %v684_v23 = vadd.f32 %v683_v4, %v682_v54  ;;  %v690_v56 = vmul.f32 %v673_v47, %v1939_v50  ;;  %v698_v42 = vmul.f32 %v680_v22, %v1936_v33  ;;  %v689_v63 = vadd.f32 %v688_v37, %v687_v20 }
 0x135   :  { %v694_v55 = vadd.f32 %v693_v44, %v692_v9  ;;  %v700_v25 = vmul.f32 %v668_v3, %v1946_v46  ;;  %v702_v26 = vmul.f32 %v680_v22, %v680_v22  ;;  %v681_v10 = vadd.f32 1.0, %v678_v58 }
 0x136   :  { %v686_v27 = vadd.f32 %v685_v21, %v684_v23  ;;  %v699_v51 = vadd.f32 %v698_v42, %v697_v11  ;;  %v704_v28 = vmul.f32 %v673_v47, %v1946_v46  ;;  %v691_v29 = vadd.f32 %v690_v56, %v689_v63 }
 0x137   :  { %v703_v17 = vadd.f32 %v702_v26, %v683_v4  ;;  %v706_v8 = vmul.f32 %v1936_v33, %v1939_v50  ;;  %v707_v34 = vmul.f32 %v680_v22, %v1946_v46  ;;  %v695_v35 = vmul.f32 %v681_v10, %v1939_v50 }
 0x138   :  { %v701_v13 = vadd.f32 %v700_v25, %v699_v51  ;;  %v709_v12 = vmul.f32 %v681_v10, %v1946_v46  ;;  %v711_v36 = vmul.f32 %v679_v52, %v668_v3  ;;  %v712_v30 = vmul.f32 %v673_v47, %v1936_v33 }
 0x139   :  { %v705_v32 = vadd.f32 %v704_v28, %v703_v17  ;;  %v708_v43 = vadd.f32 %v707_v34, %v706_v8  ;;  %v714_v1 = vmul.f32 %v681_v10, %v668_v3  ;;  %v696_v2 = vadd.f32 %v695_v35, %v694_v55 }
 0x13a   :  { %v716_v15 = vmul.f32 %v668_v3, %v1934_v0  ;;  %v717_v39 = vmul.f32 %v680_v22, %v673_v47  ;;  %v719_v45 = vmul.f32 %v681_v10, %v673_v47  ;;  %v713_v5 = vadd.f32 %v712_v30, %v711_v36 }
 0x13b   :  { %v710_v49 = vadd.f32 %v709_v12, %v708_v43  ;;  %v721_v40 = vadd.f32 %v704_v28, %v685_v21  ;;  %v722_v24 = vmul.f32 %v681_v10, %v681_v10  ;;  %v725_v53 = vsel %vm724_vm3, %v686_v27, %v679_v52 }
 0x13c   :  { %v718_v38 = vadd.f32 %v717_v39, %v716_v15  ;;  %v726_v16 = vsel %vm724_vm3, %v691_v29, %v1934_v0  ;;  %v727_v14 = vsel %vm724_vm3, %v696_v2, %v1939_v50  ;;  %v715_v60 = vadd.f32 %v714_v1, %v713_v5 }
 0x13d   :  { %v723_v61 = vadd.f32 %v722_v24, %v721_v40  ;;  %v728_v41 = vsel %vm724_vm3, %v701_v13, %v1936_v33  ;;  %v729_v62 = vsel %vm724_vm3, %v705_v32, %v680_v22  ;;  %v730_v48 = vsel %vm724_vm3, %v710_v49, %v1946_v46 }
 0x13e   :  { %v720_v57 = vadd.f32 %v719_v45, %v718_v38  ;;  %v734_v52 = vmul.f32 %v725_v53, %v725_v53  ;;  %v735_v0 = vmul.f32 %v728_v41, %v726_v16  ;;  %v731_v4 = vsel %vm724_vm3, %v715_v60, %v668_v3 }
 0x13f   :  { %v733_v50 = vsel %vm724_vm3, %v723_v61, %v681_v10  ;;  %v739_v44 = vmul.f32 %v726_v16, %v725_v53  ;;  %v740_v7 = vmul.f32 %v729_v62, %v726_v16  ;;  %v737_v22 = vmul.f32 %v731_v4, %v727_v14 }
 0x140   :  { %v732_v33 = vsel %vm724_vm3, %v720_v57, %v673_v47  ;;  %v736_v54 = vadd.f32 %v735_v0, %v734_v52  ;;  %v744_v20 = vmul.f32 %v727_v14, %v725_v53  ;;  %v745_v9 = vmul.f32 %v730_v48, %v726_v16 }
 0x141   :  { %v741_v21 = vadd.f32 %v740_v7, %v739_v44  ;;  %v742_v37 = vmul.f32 %v732_v33, %v727_v14  ;;  %v747_v46 = vmul.f32 %v733_v50, %v727_v14  ;;  %v749_v58 = vmul.f32 %v728_v41, %v725_v53 }
 0x142   :  { %v738_v11 = vadd.f32 %v737_v22, %v736_v54  ;;  %v750_v23 = vmul.f32 %v729_v62, %v728_v41  ;;  %v752_v56 = vmul.f32 %v731_v4, %v730_v48  ;;  %v746_v42 = vadd.f32 %v745_v9, %v744_v20 }
 0x143   :  { %v743_v3 = vadd.f32 %v742_v37, %v741_v21  ;;  %v754_v63 = vmul.f32 %v729_v62, %v729_v62  ;;  %v756_v55 = vmul.f32 %v732_v33, %v730_v48  ;;  %v758_v26 = vmul.f32 %v728_v41, %v727_v14 }
 0x144   :  { %v751_v25 = vadd.f32 %v750_v23, %v749_v58  ;;  %v759_v10 = vmul.f32 %v730_v48, %v729_v62  ;;  %v761_v27 = vmul.f32 %v733_v50, %v730_v48  ;;  %v748_v47 = vadd.f32 %v747_v46, %v746_v42 }
 0x145   :  { %v755_v51 = vadd.f32 %v754_v63, %v735_v0  ;;  %v763_v28 = vmul.f32 %v731_v4, %v725_v53  ;;  %v764_v29 = vmul.f32 %v732_v33, %v728_v41  ;;  %v766_v34 = vmul.f32 %v733_v50, %v731_v4 }
 0x146   :  { %v753_v17 = vadd.f32 %v752_v56, %v751_v25  ;;  %v760_v8 = vadd.f32 %v759_v10, %v758_v26  ;;  %v768_v35 = vmul.f32 %v731_v4, %v726_v16  ;;  %v769_v36 = vmul.f32 %v732_v33, %v729_v62 }
 0x147   :  { %v757_v13 = vadd.f32 %v756_v55, %v755_v51  ;;  %v765_v12 = vadd.f32 %v764_v29, %v763_v28  ;;  %v771_v32 = vmul.f32 %v733_v50, %v732_v33  ;;  %v773_v30 = vadd.f32 %v756_v55, %v737_v22 }
 0x148   :  { %v762_v43 = vadd.f32 %v761_v27, %v760_v8  ;;  %v774_v1 = vmul.f32 %v733_v50, %v733_v50  ;;  %v770_v15 = vadd.f32 %v769_v36, %v768_v35  ;;  %v777_v39 = vsel %vm776_vm4, %v738_v11, %v725_v53 }
 0x149   :  { %v767_v2 = vadd.f32 %v766_v34, %v765_v12  ;;  %v778_v45 = vsel %vm776_vm4, %v743_v3, %v726_v16  ;;  %v779_v5 = vsel %vm776_vm4, %v748_v47, %v727_v14  ;;  %v780_v40 = vsel %vm776_vm4, %v753_v17, %v728_v41 }
 0x14a   :  { %v775_v49 = vadd.f32 %v774_v1, %v773_v30  ;;  %v781_v24 = vsel %vm776_vm4, %v757_v13, %v729_v62  ;;  %v772_v38 = vadd.f32 %v771_v32, %v770_v15  ;;  %v782_v60 = vsel %vm776_vm4, %v762_v43, %v730_v48 }
 0x14b   :  { %v783_v53 = vsel %vm776_vm4, %v767_v2, %v731_v4  ;;  %v786_v61 = vmul.f32 %v777_v39, %v777_v39  ;;  %v787_v57 = vmul.f32 %v780_v40, %v778_v45  ;;  %v791_v14 = vmul.f32 %v778_v45, %v777_v39 }
 0x14c   :  { %v785_v16 = vsel %vm776_vm4, %v775_v49, %v733_v50  ;;  %v789_v52 = vmul.f32 %v783_v53, %v779_v5  ;;  %v784_v41 = vsel %vm776_vm4, %v772_v38, %v732_v33  ;;  %v792_v0 = vmul.f32 %v781_v24, %v778_v45 }
 0x14d   :  { %v796_v44 = vmul.f32 %v779_v5, %v777_v39  ;;  %v797_v62 = vmul.f32 %v782_v60, %v778_v45  ;;  %v788_v7 = vadd.f32 %v787_v57, %v786_v61  ;;  %v794_v54 = vmul.f32 %v784_v41, %v779_v5 }
 0x14e   :  { %v799_v22 = vmul.f32 %v785_v16, %v779_v5  ;;  %v801_v48 = vmul.f32 %v780_v40, %v777_v39  ;;  %v793_v20 = vadd.f32 %v792_v0, %v791_v14  ;;  %v802_v4 = vmul.f32 %v781_v24, %v780_v40 }
 0x14f   :  { %v798_v21 = vadd.f32 %v797_v62, %v796_v44  ;;  %v804_v37 = vmul.f32 %v783_v53, %v782_v60  ;;  %v790_v9 = vadd.f32 %v789_v52, %v788_v7  ;;  %v806_v46 = vmul.f32 %v781_v24, %v781_v24 }
 0x150   :  { %v808_v50 = vmul.f32 %v784_v41, %v782_v60  ;;  %v810_v11 = vmul.f32 %v780_v40, %v779_v5  ;;  %v795_v58 = vadd.f32 %v794_v54, %v793_v20  ;;  %v803_v56 = vadd.f32 %v802_v4, %v801_v48 }
 0x151   :  { %v800_v23 = vadd.f32 %v799_v22, %v798_v21  ;;  %v811_v3 = vmul.f32 %v782_v60, %v781_v24  ;;  %v807_v33 = vadd.f32 %v806_v46, %v787_v57  ;;  %v813_v42 = vmul.f32 %v785_v16, %v782_v60 }
 0x152   :  { %v815_v63 = vmul.f32 %v783_v53, %v777_v39  ;;  %v816_v55 = vmul.f32 %v784_v41, %v780_v40  ;;  %v805_v25 = vadd.f32 %v804_v37, %v803_v56  ;;  %v818_v10 = vmul.f32 %v785_v16, %v783_v53 }
 0x153   :  { %v812_v26 = vadd.f32 %v811_v3, %v810_v11  ;;  %v820_v27 = vmul.f32 %v783_v53, %v778_v45  ;;  %v809_v47 = vadd.f32 %v808_v50, %v807_v33  ;;  %v821_v28 = vmul.f32 %v784_v41, %v781_v24 }
 0x154   :  { %v817_v51 = vadd.f32 %v816_v55, %v815_v63  ;;  %v823_v29 = vmul.f32 %v785_v16, %v784_v41  ;;  %v825_v8 = vadd.f32 %v808_v50, %v789_v52  ;;  %v826_v34 = vmul.f32 %v785_v16, %v785_v16 }
 0x155   :  { %v814_v17 = vadd.f32 %v813_v42, %v812_v26  ;;  %v822_v13 = vadd.f32 %v821_v28, %v820_v27  ;;  %v829_v12 = vsel %vm828_vm5, %v790_v9, %v777_v39  ;;  %v830_v36 = vsel %vm828_vm5, %v795_v58, %v778_v45 }
 0x156   :  { %v819_v35 = vadd.f32 %v818_v10, %v817_v51  ;;  %v827_v32 = vadd.f32 %v826_v34, %v825_v8  ;;  %v831_v43 = vsel %vm828_vm5, %v800_v23, %v779_v5  ;;  %v832_v30 = vsel %vm828_vm5, %v805_v25, %v780_v40 }
 0x157   :  { %v833_v1 = vsel %vm828_vm5, %v809_v47, %v781_v24  ;;  %v824_v2 = vadd.f32 %v823_v29, %v822_v13  ;;  %v834_v15 = vsel %vm828_vm5, %v814_v17, %v782_v60  ;;  %v838_v49 = vmul.f32 %v829_v12, %v829_v12 }
 0x158   :  { %v835_v39 = vsel %vm828_vm5, %v819_v35, %v783_v53  ;;  %v837_v45 = vsel %vm828_vm5, %v827_v32, %v785_v16  ;;  %v839_v38 = vmul.f32 %v832_v30, %v830_v36  ;;  %v843_v5 = vmul.f32 %v830_v36, %v829_v12 }
 0x159   :  { %v841_v61 = vmul.f32 %v835_v39, %v831_v43  ;;  %v836_v40 = vsel %vm828_vm5, %v824_v2, %v784_v41  ;;  %v844_v57 = vmul.f32 %v833_v1, %v830_v36  ;;  %v848_v52 = vmul.f32 %v831_v43, %v829_v12 }
 0x15a   :  { %v849_v24 = vmul.f32 %v834_v15, %v830_v36  ;;  %v840_v14 = vadd.f32 %v839_v38, %v838_v49  ;;  %v846_v0 = vmul.f32 %v836_v40, %v831_v43  ;;  %v851_v44 = vmul.f32 %v837_v45, %v831_v43 }
 0x15b   :  { %v853_v60 = vmul.f32 %v832_v30, %v829_v12  ;;  %v845_v62 = vadd.f32 %v844_v57, %v843_v5  ;;  %v854_v53 = vmul.f32 %v833_v1, %v832_v30  ;;  %v856_v54 = vmul.f32 %v835_v39, %v834_v15 }
 0x15c   :  { %v850_v7 = vadd.f32 %v849_v24, %v848_v52  ;;  %v842_v22 = vadd.f32 %v841_v61, %v840_v14  ;;  %v858_v48 = vmul.f32 %v833_v1, %v833_v1  ;;  %v860_v16 = vmul.f32 %v836_v40, %v834_v15 }
 0x15d   :  { %v862_v20 = vmul.f32 %v832_v30, %v831_v43  ;;  %v847_v21 = vadd.f32 %v846_v0, %v845_v62  ;;  %v855_v37 = vadd.f32 %v854_v53, %v853_v60  ;;  %v863_v9 = vmul.f32 %v834_v15, %v833_v1 }
 0x15e   :  { %v852_v4 = vadd.f32 %v851_v44, %v850_v7  ;;  %v859_v41 = vadd.f32 %v858_v48, %v839_v38  ;;  %v865_v46 = vmul.f32 %v837_v45, %v834_v15  ;;  %v867_v50 = vmul.f32 %v835_v39, %v829_v12 }
 0x15f   :  { %v868_v11 = vmul.f32 %v836_v40, %v832_v30  ;;  %v857_v58 = vadd.f32 %v856_v54, %v855_v37  ;;  %v864_v23 = vadd.f32 %v863_v9, %v862_v20  ;;  %v870_v56 = vmul.f32 %v837_v45, %v835_v39 }
 0x160   :  { %v872_v3 = vmul.f32 %v835_v39, %v830_v36  ;;  %v861_v33 = vadd.f32 %v860_v16, %v859_v41  ;;  %v873_v63 = vmul.f32 %v836_v40, %v833_v1  ;;  %v875_v55 = vmul.f32 %v837_v45, %v836_v40 }
 0x161   :  { %v869_v42 = vadd.f32 %v868_v11, %v867_v50  ;;  %v866_v25 = vadd.f32 %v865_v46, %v864_v23  ;;  %v877_v26 = vadd.f32 %v860_v16, %v841_v61  ;;  %v878_v10 = vmul.f32 %v837_v45, %v837_v45 }
 0x162   :  { %v874_v47 = vadd.f32 %v873_v63, %v872_v3  ;;  %v881_v51 = vsel %vm880_vm6, %v842_v22, %v829_v12   ;;  %v882_v28 = vsel %vm880_vm6, %v847_v21, %v830_v36   ;;  %v883_v17 = vsel %vm880_vm6, %v852_v4, %v831_v43  }
 0x163   :  { %v871_v27 = vadd.f32 %v870_v56, %v869_v42  ;;  %v879_v29 = vadd.f32 %v878_v10, %v877_v26  ;;  %v884_v8 = vsel %vm880_vm6, %v857_v58, %v832_v30   ;;  %v885_v34 = vsel %vm880_vm6, %v861_v33, %v833_v1  }
 0x164   :  { %v876_v35 = vadd.f32 %v875_v55, %v874_v47  ;;  %v886_v13 = vsel %vm880_vm6, %v866_v25, %v834_v15   ;;  %v901_v38 = vcvt.f32.s32 %v1755_v18  ;;  %v2176_v0 = vmov %v883_v17 }
 0x165   :  { %v887_v32 = vsel %vm880_vm6, %v871_v27, %v835_v39   ;;  %v889_v2 = vsel %vm880_vm6, %v879_v29, %v837_v45   ;;  %v2173_v39 = vmov %v886_v13  ;;  %v2174_v45 = vmov %v885_v34 }
 0x166   :  { %v888_v49 = vsel %vm880_vm6, %v876_v35, %v836_v40   ;;  %v902_v57 = vshll.u32 %v901_v38, 16  ;;  %v2170_v18 = vmov %v889_v2  ;;  %v2172_v15 = vmov %v887_v32 }
 0x167   :  { %v2171_v1 = vmov %v888_v49  ;;  %v2175_v40 = vmov %v884_v8  ;;  %v2177_v44 = vmov %v882_v28  ;;  %v2178_v60 = vmov %v881_v51 }
 0x174   :  { %v899_v5 = vpop.xlane.xlu0 %898 }
 0x175   :  { %v900_v61 = vcvt.f32.s32 %v899_v5 }
 0x177   :  { %v903_v52 = vadd.s32 %v902_v57, %v900_v61 }
 0x179   :  { %v904_v24 = vrot.slane %v903_v52, 4 }
 0x17b   :  { %vm905_vm7 = vcmp.gt.s32.totalorder %v903_v52, %v904_v24 }
 0x17c   :  { %v906_v14 = vsel %vm905_vm7, %v903_v52, %v904_v24 }
 0x17d   :  { %v907_v12 = vrot.slane %v906_v14, 2 }
 0x17f   :  { %vm908_vm8 = vcmp.gt.s32.totalorder %v906_v14, %v907_v12 }
 0x180   :  { %v909_v36 = vsel %vm908_vm8, %v906_v14, %v907_v12 }
 0x181   :  { %v910_v43 = vrot.slane %v909_v36, 1 }
 0x183   :  { %vm911_vm9 = vcmp.gt.s32.totalorder %v909_v36, %v910_v43 }
 0x184   :  { %v912_v30 = vsel %vm911_vm9, %v909_v36, %v910_v43 }
 0x185   :  { %1096 = vpush %v912_v30 }
 0x1b6   :  { %s2035_s2 = spop %1096 }
 0x1b7   :  { %p1093_p5 = scmp.le.s32.totalorder %s2035_s2, 4 }
 0x1b8   :  { %s2074_s30 = smov (!%p1093_p5), 4  }
 0x1b9   :  { %1018 = sbr.rel (%p1093_p5) target bundleno = 467 (0x1d3), region = 39 }
 0x1c0 LB: > { %v929_v62 = vmul.f32 %v1375_v51, %v1375_v51  ;;  %v930_v7 = vmul.f32 %v1363_v8, %v1371_v28  ;;  %v932_v53 = vmul.f32 %v1351_v32, %v1367_v17  ;;  %v934_v54 = vmul.f32 %v1371_v28, %v1375_v51  ;;  %s1379_s30 = sphi %s2074_s30, %s917_s30   ;;  %v1375_v51 = vphi %v881_v51, %v2187_v51   ;;  %v1371_v28 = vphi %v882_v28, %v2186_v28   ;;  %v1367_v17 = vphi %v883_v17, %v2185_v17   ;;  %v1363_v8 = vphi %v884_v8, %v2184_v8   ;;  %v1359_v34 = vphi %v885_v34, %v2183_v34   ;;  %v1355_v13 = vphi %v886_v13, %v2182_v13   ;;  %v1351_v32 = vphi %v887_v32, %v2181_v32   ;;  %v1347_v49 = vphi %v888_v49, %v2180_v49   ;;  %v1343_v2 = vphi %v889_v2, %v2179_v2  }
 0x1c1   : > { %v935_v22 = vmul.f32 %v1359_v34, %v1371_v28  ;;  %v937_v48 = vmul.f32 %v1347_v49, %v1367_v17  ;;  %v939_v20 = vmul.f32 %v1367_v17, %v1375_v51  ;;  %v940_v21 = vmul.f32 %v1355_v13, %v1371_v28 }
 0x1c2   : > { %v931_v16 = vadd.f32 %v930_v7, %v929_v62  ;;  %v942_v4 = vmul.f32 %v1343_v2, %v1367_v17  ;;  %v944_v9 = vmul.f32 %v1363_v8, %v1375_v51  ;;  %v945_v41 = vmul.f32 %v1359_v34, %v1363_v8 }
 0x1c3   : > { %v936_v37 = vadd.f32 %v935_v22, %v934_v54  ;;  %v947_v46 = vmul.f32 %v1351_v32, %v1355_v13  ;;  %v941_v11 = vadd.f32 %v940_v21, %v939_v20  ;;  %v949_v58 = vmul.f32 %v1359_v34, %v1359_v34 }
 0x1c4   : > { %v933_v50 = vadd.f32 %v932_v53, %v931_v16  ;;  %v951_v23 = vmul.f32 %v1347_v49, %v1355_v13  ;;  %v946_v3 = vadd.f32 %v945_v41, %v944_v9  ;;  %v953_v33 = vmul.f32 %v1363_v8, %v1367_v17 }
 0x1c5   : > { %v938_v56 = vadd.f32 %v937_v48, %v936_v37  ;;  %v954_v42 = vmul.f32 %v1355_v13, %v1359_v34  ;;  %v943_v63 = vadd.f32 %v942_v4, %v941_v11  ;;  %v950_v55 = vadd.f32 %v949_v58, %v930_v7 }
 0x1c6   : > { %v956_v25 = vmul.f32 %v1343_v2, %v1355_v13  ;;  %v958_v26 = vmul.f32 %v1351_v32, %v1375_v51  ;;  %v948_v10 = vadd.f32 %v947_v46, %v946_v3  ;;  %v959_v47 = vmul.f32 %v1347_v49, %v1363_v8 }
 0x1c7   : > { %v955_v27 = vadd.f32 %v954_v42, %v953_v33  ;;  %v961_v29 = vmul.f32 %v1343_v2, %v1351_v32  ;;  %v952_v35 = vadd.f32 %v951_v23, %v950_v55  ;;  %v963_v38 = vmul.f32 %v1351_v32, %v1371_v28 }
 0x1c8   : > { %v964_v5 = vmul.f32 %v1347_v49, %v1359_v34  ;;  %v966_v61 = vmul.f32 %v1343_v2, %v1347_v49  ;;  %v960_v52 = vadd.f32 %v959_v47, %v958_v26  ;;  %v968_v24 = vadd.f32 %v951_v23, %v932_v53 }
 0x1c9   : > { %v957_v57 = vadd.f32 %v956_v25, %v955_v27  ;;  %v969_v14 = vmul.f32 %v1343_v2, %v1343_v2  ;;  %v971_v36 = vstv %s1379_s30  ;;  %s917_s30 = sadd.s32 1, %s1379_s30  }
 0x1ca   : > { %v965_v12 = vadd.f32 %v964_v5, %v963_v38  ;;  %v962_v43 = vadd.f32 %v961_v29, %v960_v52  ;;  %vm972_vm10 = vcmp.lt.s32.totalorder %v971_v36, %v1690_v6  ;;  %p916_p6 = scmp.ge.s32.totalorder %s917_s30, %s2035_s2 }
 0x1cb   : > { %v970_v30 = vadd.f32 %v969_v14, %v968_v24  ;;  %v973_v60 = vsel %vm972_vm10, %v933_v50, %v1375_v51   ;;  %v974_v44 = vsel %vm972_vm10, %v938_v56, %v1371_v28   ;;  %v975_v0 = vsel %vm972_vm10, %v943_v63, %v1367_v17  }
 0x1cc   : > { %v967_v18 = vadd.f32 %v966_v61, %v965_v12  ;;  %v976_v40 = vsel %vm972_vm10, %v948_v10, %v1363_v8   ;;  %v977_v45 = vsel %vm972_vm10, %v952_v35, %v1359_v34   ;;  %v978_v39 = vsel %vm972_vm10, %v957_v57, %v1355_v13   ;;  %919 = sbr.rel (!%p916_p6) target bundleno = 448 (0x1c0), region = 45 }
 0x1cd   : > { %v979_v15 = vsel %vm972_vm10, %v962_v43, %v1351_v32   ;;  %v981_v62 = vsel %vm972_vm10, %v970_v30, %v1343_v2   ;;  %v2182_v13 = vmov %v978_v39  ;;  %v2183_v34 = vmov %v977_v45 }
 0x1ce   : > { %v980_v1 = vsel %vm972_vm10, %v967_v18, %v1347_v49   ;;  %v2179_v2 = vmov %v981_v62  ;;  %v2181_v32 = vmov %v979_v15  ;;  %v2184_v8 = vmov %v976_v40 }
 0x1cf   : > { %v2180_v49 = vmov %v980_v1  ;;  %v2185_v17 = vmov %v975_v0  ;;  %v2186_v28 = vmov %v974_v44  ;;  %v2187_v51 = vmov %v973_v60 }
 0x1d0   :  { %v2188_v18 = vmov (%p916_p6), %v981_v62 }
 0x1d3 PF:  { %v982_v6 = vmul.f32 %v1415_v60, %v1797_v59  ;;  %v983_v51 = vmul.f32 %v1411_v44, %v1802_v19  ;;  %v985_v28 = vmul.f32 %v1407_v0, %v1807_v31  ;;  %v988_v17 = vmul.f32 %v1403_v40, %v1797_v59  ;;  %v1415_v60 = vphi %v2178_v60, %v973_v60   ;;  %v1411_v44 = vphi %v2177_v44, %v974_v44   ;;  %v1407_v0 = vphi %v2176_v0, %v975_v0   ;;  %v1403_v40 = vphi %v2175_v40, %v976_v40   ;;  %v1399_v45 = vphi %v2174_v45, %v977_v45   ;;  %v1395_v39 = vphi %v2173_v39, %v978_v39   ;;  %v1391_v15 = vphi %v2172_v15, %v979_v15   ;;  %v1387_v1 = vphi %v2171_v1, %v980_v1   ;;  %v1383_v18 = vphi %v2170_v18, %v2188_v18  }
 0x1d4   :  { %v989_v8 = vmul.f32 %v1399_v45, %v1802_v19  ;;  %v991_v34 = vmul.f32 %v1395_v39, %v1807_v31  ;;  %v995_v13 = vmul.f32 %v1391_v15, %v1797_v59  ;;  %v996_v32 = vmul.f32 %v1387_v1, %v1802_v19 }
 0x1d5   :  { %v984_v2 = vadd.f32 %v983_v51, %v982_v6  ;;  %v998_v49 = vmul.f32 %v1383_v18, %v1807_v31 }
 0x1d6   :  { %v990_v7 = vadd.f32 %v989_v8, %v988_v17  ;;  %v997_v53 = vadd.f32 %v996_v32, %v995_v13 }
 0x1d7   :  { %v986_v54 = vadd.f32 %v985_v28, %v984_v2 }
 0x1d8   :  { %v992_v22 = vadd.f32 %v991_v34, %v990_v7  ;;  %v999_v48 = vadd.f32 %v998_v49, %v997_v53 }
 0x1d9   :  { %987 = vst [vmem:[%s2169_s3] sm:$0xff] %v986_v54 }
 0x1da   :  { %1094 = vst [vmem:[%s2169_s3 + $0x8] sm:$0xff] %v992_v22  ;;  %1095 = vst [vmem:[%s2169_s3 + $0x10] sm:$0xff] %v999_v48 }
 0x1db   :  { %1006 = vsyncpa [#allocation3], 1 }

</bundles_post_ra>
